<compile_context>
chip_gen: v7x
topology: tpu7x:2x2x1
jax: 0.10.0
libtpu: 0.0.40
codegen_flags: <defaults>
</compile_context>

<pallas_src>
import jax
import jax.numpy as jnp
from jax.experimental import pallas as pl
from jax.experimental.pallas import tpu as pltpu


def _upsample_conv_kernel(x_ref, w_ref, b_ref, o_ref):
    """One (batch, row-stripe) grid step of nearest-x2 upsample + 3x3 conv.

    x_ref: (1, H+2, W+2, C)   padded ORIGINAL-res input (bf16); whole image per
                              batch element, VMEM-resident across the stripe axis.
    w_ref: (4, 4*C, C)        phase-combined weights, im2col row layout (bf16).
    b_ref: (1, C)             bias (f32).
    o_ref: (1, 4, TH*W, C)    output stripe, phase-separated, rows flattened.
    """
    W = x_ref.shape[2] - 2
    C = o_ref.shape[-1]
    TH = o_ref.shape[2] // W          # original-resolution rows per stripe

    s = pl.program_id(1)
    i0 = pl.multiple_of(s * TH, TH)

    # Load the halo'd stripe (TH+2 padded rows) once; the 16 shifted windows
    # below are static slices of this single loaded value.
    x = x_ref[0, pl.ds(i0, TH + 2), :, :]     # (TH+2, W+2, C), bf16
    bias = b_ref[...].astype(jnp.float32)     # (1, C)

    for py in range(2):
        for px in range(2):
            p = 2 * py + px
            # im2col: stack the 4 (tr, tc) taps along channels -> K = 4*C,
            # then a single dense MXU matmul with M = TH*W for this phase.
            taps = []
            for tr in range(2):
                for tc in range(2):
                    taps.append(x[py + tr:py + tr + TH,
                                  px + tc:px + tc + W, :])
            patch = jnp.concatenate(taps, axis=-1).reshape(TH * W, 4 * C)
            acc = jnp.dot(patch, w_ref[p],
                          preferred_element_type=jnp.float32)      # (TH*W, C)
            # Bias added once in the f32 epilogue, then cast on store.
            o_ref[0, p] = (acc + bias).astype(o_ref.dtype)


def _phase_weights(weight_oihw):
    """Fold the nearest-x2 upsample into the 3x3 conv weights.

    Returns (4, 4*Cin, Cout) with row index (2*tr + tc)*Cin + ci for phase
    p = 2*py + px, matching the kernel's im2col channel layout.
    """
    c_out, c_in = weight_oihw.shape[0], weight_oihw.shape[1]
    w = jnp.transpose(weight_oihw, (2, 3, 1, 0)).astype(jnp.float32)  # (3,3,Ci,Co)
    # sel[p][t, k] == 1 iff 3x3 kernel index k contributes to 2-tap index t
    # of output phase p (same mapping for rows and columns).
    sel = (jnp.array([[1., 0., 0.], [0., 1., 1.]], jnp.float32),      # phase 0
           jnp.array([[1., 1., 0.], [0., 0., 1.]], jnp.float32))      # phase 1
    blocks = []
    for py in range(2):
        for px in range(2):
            comb = jnp.einsum('rk,cl,klio->rcio', sel[py], sel[px], w)  # (2,2,Ci,Co)
            blocks.append(comb.reshape(4 * c_in, c_out))
    return jnp.stack(blocks)                                          # (4,4Ci,Co)


def _pick_stripe_rows(H, W, C, out_itemsize, target_bytes=4 << 20, min_stripes=2):
    """Largest row stripe whose 4-phase output block fits `target_bytes`,
    preferring >= `min_stripes` stripes so the spatial axis feeds both v7x
    TensorCores and pipelines output writebacks."""
    divisors = [t for t in range(H, 0, -1) if H % t == 0]
    valid = [t for t in divisors if (t * W) % 8 == 0 or t == H]
    fitting = [t for t in valid if 4 * t * W * C * out_itemsize <= target_bytes]
    pool = fitting if fitting else [valid[-1]]
    for t in pool:
        if H // t >= min_stripes:
            return t
    return pool[0]


def upsample_forward(x_nchw, weight_oihw, bias, *, compute_dtype=jnp.bfloat16):
    """Upsample.forward: nearest-x2 upsample followed by Conv2d(C, C, 3, pad=1).

    NCHW in -> NCHW out (PyTorch semantics).
    """
    B, C, H, W = x_nchw.shape
    out_dtype = x_nchw.dtype
    out_itemsize = jnp.dtype(out_dtype).itemsize
    cd_itemsize = jnp.dtype(compute_dtype).itemsize

    # Layout glue at ORIGINAL resolution only: NCHW->NHWC + 1-pixel zero halo.
    x_nhwc = jnp.transpose(x_nchw, (0, 2, 3, 1))
    x_pad = jnp.pad(x_nhwc, ((0, 0), (1, 1), (1, 1), (0, 0))).astype(compute_dtype)

    w_comb = _phase_weights(weight_oihw).astype(compute_dtype)     # (4, 4C, C)
    b2 = bias.reshape(1, C).astype(jnp.float32)

    TH = _pick_stripe_rows(H, W, C, out_itemsize)
    n_stripes = H // TH

    # VMEM budget: double-buffered per-batch input image + output stripes + weights.
    in_block = (H + 2) * (W + 2) * C * cd_itemsize
    out_block = 4 * TH * W * C * out_itemsize
    w_bytes = 4 * 4 * C * C * cd_itemsize
    need = 2 * in_block + 2 * out_block + w_bytes
    vmem_limit = int(min(max(2 * need, 16 << 20), 48 << 20))   # 48 MiB fits v7x

    flops = 2 * B * H * W * 4 * (4 * C) * C
    bytes_accessed = int(x_pad.size * cd_itemsize + 4 * 4 * C * C * cd_itemsize
                         + C * 4 + B * 4 * H * W * C * out_itemsize)

    y = pl.pallas_call(
        _upsample_conv_kernel,
        out_shape=jax.ShapeDtypeStruct((B, 4, H * W, C), out_dtype),
        grid=(B, n_stripes),
        in_specs=[
            pl.BlockSpec((1, H + 2, W + 2, C), lambda b, s: (b, 0, 0, 0)),
            pl.BlockSpec((4, 4 * C, C), lambda b, s: (0, 0, 0)),
            pl.BlockSpec((1, C), lambda b, s: (0, 0)),
        ],
        out_specs=pl.BlockSpec((1, 4, TH * W, C), lambda b, s: (b, 0, s, 0)),
        compiler_params=pltpu.CompilerParams(
            dimension_semantics=("parallel", "parallel"),
            vmem_limit_bytes=vmem_limit),
        cost_estimate=pl.CostEstimate(flops=flops, transcendentals=0,
                                      bytes_accessed=bytes_accessed),
    )(x_pad, w_comb, b2)

    # Phase-separated (B, p, H*W, C) -> NCHW (B, C, 2H, 2W).
    y = y.reshape(B, 2, 2, H, W, C)                 # (b, py, px, i, j, c)
    y = jnp.transpose(y, (0, 5, 3, 1, 4, 2))        # (b, c, i, py, j, px)
    return y.reshape(B, C, 2 * H, 2 * W)


if __name__ == "__main__":
    key = jax.random.PRNGKey(0)
    kx, kw, kb = jax.random.split(key, 3)

    B, C, H, W = 2, 4, 16, 16
    x = jax.random.normal(kx, (B, C, H, W), dtype=jnp.float32)

    # Deterministic synthetic Conv2d(channels, channels, 3, padding=1) params
    # (PyTorch shapes: weight (C, C, 3, 3), bias (C,)).
    fan_in = C * 3 * 3
    bound = 1.0 / (fan_in ** 0.5)
    weight = jax.random.uniform(kw, (C, C, 3, 3), jnp.float32, -bound, bound)
    bias = jax.random.uniform(kb, (C,), jnp.float32, -bound, bound)

    out = jax.jit(upsample_forward)(x, weight, bias)
    out = jax.block_until_ready(out)
    assert out.shape == (B, C, 2 * H, 2 * W), out.shape

    # Reference: plain-JAX f32 conv of the nearest-x2 upsampled input.
    x_up = jnp.repeat(jnp.repeat(x, 2, axis=2), 2, axis=3)
    ref = jax.lax.conv_general_dilated(
        x_up, weight, window_strides=(1, 1), padding=((1, 1), (1, 1)),
        dimension_numbers=('NCHW', 'OIHW', 'NCHW')) + bias[None, :, None, None]
    # bf16 MXU operands + f32 accumulation -> ~1e-2-level agreement vs f32 ref.
    err = float(jnp.max(jnp.abs(out - ref)))
    assert jnp.allclose(out, ref, atol=5e-2, rtol=5e-2), f"mismatch max|err|={err}"

    print("KERNEL_OK")
</pallas_src>

<mosaic_0001>
module attributes {stable_mosaic.version = 11 : i64} {
  func.func @_upsample_conv_kernel(%arg0: i32, %arg1: i32, %arg2: memref<1x18x18x4xbf16, #tpu.memory_space<vmem>>, %arg3: memref<4x16x4xbf16, #tpu.memory_space<vmem>>, %arg4: memref<1x4xf32, #tpu.memory_space<vmem>>, %arg5: memref<1x4x128x4xf32, #tpu.memory_space<vmem>>) attributes {dimension_semantics = [#tpu.dimension_semantics<parallel>, #tpu.dimension_semantics<parallel>], iteration_bounds = array<i64: 2, 2>, scalar_prefetch = 0 : i64, scratch_operands = 0 : i64, tpu.core_type = #tpu.core_type<tc>, window_params = [{transform_indices = @transform_0, window_bounds = array<i64: 1, 18, 18, 4>}, {pipeline_mode = #tpu.pipeline_mode<synchronous>, transform_indices = @transform_1, window_bounds = array<i64: 4, 16, 4>}, {pipeline_mode = #tpu.pipeline_mode<synchronous>, transform_indices = @transform_2, window_bounds = array<i64: 1, 4>}, {transform_indices = @transform_3, window_bounds = array<i64: 1, 4, 128, 4>}]} {
    %c8_i32 = arith.constant 8 : i32
    %0 = arith.muli %arg1, %c8_i32 : i32
    %1 = tpu.assume_multiple %0, 8 : i32
    %c0 = arith.constant 0 : index
    %2 = arith.index_cast %1 : i32 to index
    %c0_0 = arith.constant 0 : index
    %c0_1 = arith.constant 0 : index
    %3 = vector.load %arg2[%c0, %2, %c0_0, %c0_1] : memref<1x18x18x4xbf16, #tpu.memory_space<vmem>>, vector<1x10x18x4xbf16>
    %4 = vector.shape_cast %3 : vector<1x10x18x4xbf16> to vector<10x18x4xbf16>
    %c0_2 = arith.constant 0 : index
    %c0_3 = arith.constant 0 : index
    %5 = vector.load %arg4[%c0_2, %c0_3] : memref<1x4xf32, #tpu.memory_space<vmem>>, vector<1x4xf32>
    %6 = vector.extract_strided_slice %4 {offsets = [0, 0, 0], sizes = [8, 16, 4], strides = [1, 1, 1]} : vector<10x18x4xbf16> to vector<8x16x4xbf16>
    %7 = vector.extract_strided_slice %4 {offsets = [0, 1, 0], sizes = [8, 16, 4], strides = [1, 1, 1]} : vector<10x18x4xbf16> to vector<8x16x4xbf16>
    %8 = vector.extract_strided_slice %4 {offsets = [1, 0, 0], sizes = [8, 16, 4], strides = [1, 1, 1]} : vector<10x18x4xbf16> to vector<8x16x4xbf16>
    %9 = vector.extract_strided_slice %4 {offsets = [1, 1, 0], sizes = [8, 16, 4], strides = [1, 1, 1]} : vector<10x18x4xbf16> to vector<8x16x4xbf16>
    %10 = tpu.concatenate %6, %7, %8, %9 in 2 : vector<8x16x4xbf16>, vector<8x16x4xbf16>, vector<8x16x4xbf16>, vector<8x16x4xbf16> -> vector<8x16x16xbf16>
    %11 = vector.shape_cast %10 : vector<8x16x16xbf16> to vector<128x16xbf16>
    %c0_4 = arith.constant 0 : index
    %c0_5 = arith.constant 0 : index
    %c0_6 = arith.constant 0 : index
    %12 = vector.load %arg3[%c0_4, %c0_5, %c0_6] : memref<4x16x4xbf16, #tpu.memory_space<vmem>>, vector<1x16x4xbf16>
    %13 = vector.shape_cast %12 : vector<1x16x4xbf16> to vector<16x4xbf16>
    %cst = arith.constant dense<0.000000e+00> : vector<128x4xf32>
    %14 = tpu.matmul %11, %13, %cst {dimension_numbers = #tpu.dot_dimension_numbers<[1], [0], [0], [1], [0, 0, 1, 1], [], []>} : vector<128x16xbf16>, vector<16x4xbf16>, vector<128x4xf32> -> vector<128x4xf32>
    %15 = vector.broadcast %5 : vector<1x4xf32> to vector<128x4xf32>
    %16 = arith.addf %14, %15 : vector<128x4xf32>
    %c0_7 = arith.constant 0 : index
    %c0_8 = arith.constant 0 : index
    %c0_9 = arith.constant 0 : index
    %c0_10 = arith.constant 0 : index
    %17 = vector.load %arg5[%c0_7, %c0_8, %c0_9, %c0_10] : memref<1x4x128x4xf32, #tpu.memory_space<vmem>>, vector<1x1x128x4xf32>
    %18 = vector.shape_cast %17 : vector<1x1x128x4xf32> to vector<128x4xf32>
    %19 = vector.shape_cast %16 : vector<128x4xf32> to vector<1x1x128x4xf32>
    tpu.vector_store %arg5[%c0_7, %c0_8, %c0_9, %c0_10], %19 {strides = array<i32>} : memref<1x4x128x4xf32, #tpu.memory_space<vmem>>, vector<1x1x128x4xf32>,
    %20 = vector.extract_strided_slice %4 {offsets = [0, 1, 0], sizes = [8, 16, 4], strides = [1, 1, 1]} : vector<10x18x4xbf16> to vector<8x16x4xbf16>
    %21 = vector.extract_strided_slice %4 {offsets = [0, 2, 0], sizes = [8, 16, 4], strides = [1, 1, 1]} : vector<10x18x4xbf16> to vector<8x16x4xbf16>
    %22 = vector.extract_strided_slice %4 {offsets = [1, 1, 0], sizes = [8, 16, 4], strides = [1, 1, 1]} : vector<10x18x4xbf16> to vector<8x16x4xbf16>
    %23 = vector.extract_strided_slice %4 {offsets = [1, 2, 0], sizes = [8, 16, 4], strides = [1, 1, 1]} : vector<10x18x4xbf16> to vector<8x16x4xbf16>
    %24 = tpu.concatenate %20, %21, %22, %23 in 2 : vector<8x16x4xbf16>, vector<8x16x4xbf16>, vector<8x16x4xbf16>, vector<8x16x4xbf16> -> vector<8x16x16xbf16>
    %25 = vector.shape_cast %24 : vector<8x16x16xbf16> to vector<128x16xbf16>
    %c1 = arith.constant 1 : index
    %c0_11 = arith.constant 0 : index
    %c0_12 = arith.constant 0 : index
    %26 = vector.load %arg3[%c1, %c0_11, %c0_12] : memref<4x16x4xbf16, #tpu.memory_space<vmem>>, vector<1x16x4xbf16>
    %27 = vector.shape_cast %26 : vector<1x16x4xbf16> to vector<16x4xbf16>
    %cst_13 = arith.constant dense<0.000000e+00> : vector<128x4xf32>
    %28 = tpu.matmul %25, %27, %cst_13 {dimension_numbers = #tpu.dot_dimension_numbers<[1], [0], [0], [1], [0, 0, 1, 1], [], []>} : vector<128x16xbf16>, vector<16x4xbf16>, vector<128x4xf32> -> vector<128x4xf32>
    %29 = vector.broadcast %5 : vector<1x4xf32> to vector<128x4xf32>
    %30 = arith.addf %28, %29 : vector<128x4xf32>
    %c0_14 = arith.constant 0 : index
    %c1_15 = arith.constant 1 : index
    %c0_16 = arith.constant 0 : index
    %c0_17 = arith.constant 0 : index
    %31 = vector.load %arg5[%c0_14, %c1_15, %c0_16, %c0_17] : memref<1x4x128x4xf32, #tpu.memory_space<vmem>>, vector<1x1x128x4xf32>
    %32 = vector.shape_cast %31 : vector<1x1x128x4xf32> to vector<128x4xf32>
    %33 = vector.shape_cast %30 : vector<128x4xf32> to vector<1x1x128x4xf32>
    tpu.vector_store %arg5[%c0_14, %c1_15, %c0_16, %c0_17], %33 {strides = array<i32>} : memref<1x4x128x4xf32, #tpu.memory_space<vmem>>, vector<1x1x128x4xf32>,
    %34 = vector.extract_strided_slice %4 {offsets = [1, 0, 0], sizes = [8, 16, 4], strides = [1, 1, 1]} : vector<10x18x4xbf16> to vector<8x16x4xbf16>
    %35 = vector.extract_strided_slice %4 {offsets = [1, 1, 0], sizes = [8, 16, 4], strides = [1, 1, 1]} : vector<10x18x4xbf16> to vector<8x16x4xbf16>
    %36 = vector.extract_strided_slice %4 {offsets = [2, 0, 0], sizes = [8, 16, 4], strides = [1, 1, 1]} : vector<10x18x4xbf16> to vector<8x16x4xbf16>
    %37 = vector.extract_strided_slice %4 {offsets = [2, 1, 0], sizes = [8, 16, 4], strides = [1, 1, 1]} : vector<10x18x4xbf16> to vector<8x16x4xbf16>
    %38 = tpu.concatenate %34, %35, %36, %37 in 2 : vector<8x16x4xbf16>, vector<8x16x4xbf16>, vector<8x16x4xbf16>, vector<8x16x4xbf16> -> vector<8x16x16xbf16>
    %39 = vector.shape_cast %38 : vector<8x16x16xbf16> to vector<128x16xbf16>
    %c2 = arith.constant 2 : index
    %c0_18 = arith.constant 0 : index
    %c0_19 = arith.constant 0 : index
    %40 = vector.load %arg3[%c2, %c0_18, %c0_19] : memref<4x16x4xbf16, #tpu.memory_space<vmem>>, vector<1x16x4xbf16>
    %41 = vector.shape_cast %40 : vector<1x16x4xbf16> to vector<16x4xbf16>
    %cst_20 = arith.constant dense<0.000000e+00> : vector<128x4xf32>
    %42 = tpu.matmul %39, %41, %cst_20 {dimension_numbers = #tpu.dot_dimension_numbers<[1], [0], [0], [1], [0, 0, 1, 1], [], []>} : vector<128x16xbf16>, vector<16x4xbf16>, vector<128x4xf32> -> vector<128x4xf32>
    %43 = vector.broadcast %5 : vector<1x4xf32> to vector<128x4xf32>
    %44 = arith.addf %42, %43 : vector<128x4xf32>
    %c0_21 = arith.constant 0 : index
    %c2_22 = arith.constant 2 : index
    %c0_23 = arith.constant 0 : index
    %c0_24 = arith.constant 0 : index
    %45 = vector.load %arg5[%c0_21, %c2_22, %c0_23, %c0_24] : memref<1x4x128x4xf32, #tpu.memory_space<vmem>>, vector<1x1x128x4xf32>
    %46 = vector.shape_cast %45 : vector<1x1x128x4xf32> to vector<128x4xf32>
    %47 = vector.shape_cast %44 : vector<128x4xf32> to vector<1x1x128x4xf32>
    tpu.vector_store %arg5[%c0_21, %c2_22, %c0_23, %c0_24], %47 {strides = array<i32>} : memref<1x4x128x4xf32, #tpu.memory_space<vmem>>, vector<1x1x128x4xf32>,
    %48 = vector.extract_strided_slice %4 {offsets = [1, 1, 0], sizes = [8, 16, 4], strides = [1, 1, 1]} : vector<10x18x4xbf16> to vector<8x16x4xbf16>
    %49 = vector.extract_strided_slice %4 {offsets = [1, 2, 0], sizes = [8, 16, 4], strides = [1, 1, 1]} : vector<10x18x4xbf16> to vector<8x16x4xbf16>
    %50 = vector.extract_strided_slice %4 {offsets = [2, 1, 0], sizes = [8, 16, 4], strides = [1, 1, 1]} : vector<10x18x4xbf16> to vector<8x16x4xbf16>
    %51 = vector.extract_strided_slice %4 {offsets = [2, 2, 0], sizes = [8, 16, 4], strides = [1, 1, 1]} : vector<10x18x4xbf16> to vector<8x16x4xbf16>
    %52 = tpu.concatenate %48, %49, %50, %51 in 2 : vector<8x16x4xbf16>, vector<8x16x4xbf16>, vector<8x16x4xbf16>, vector<8x16x4xbf16> -> vector<8x16x16xbf16>
    %53 = vector.shape_cast %52 : vector<8x16x16xbf16> to vector<128x16xbf16>
    %c3 = arith.constant 3 : index
    %c0_25 = arith.constant 0 : index
    %c0_26 = arith.constant 0 : index
    %54 = vector.load %arg3[%c3, %c0_25, %c0_26] : memref<4x16x4xbf16, #tpu.memory_space<vmem>>, vector<1x16x4xbf16>
    %55 = vector.shape_cast %54 : vector<1x16x4xbf16> to vector<16x4xbf16>
    %cst_27 = arith.constant dense<0.000000e+00> : vector<128x4xf32>
    %56 = tpu.matmul %53, %55, %cst_27 {dimension_numbers = #tpu.dot_dimension_numbers<[1], [0], [0], [1], [0, 0, 1, 1], [], []>} : vector<128x16xbf16>, vector<16x4xbf16>, vector<128x4xf32> -> vector<128x4xf32>
    %57 = vector.broadcast %5 : vector<1x4xf32> to vector<128x4xf32>
    %58 = arith.addf %56, %57 : vector<128x4xf32>
    %c0_28 = arith.constant 0 : index
    %c3_29 = arith.constant 3 : index
    %c0_30 = arith.constant 0 : index
    %c0_31 = arith.constant 0 : index
    %59 = vector.load %arg5[%c0_28, %c3_29, %c0_30, %c0_31] : memref<1x4x128x4xf32, #tpu.memory_space<vmem>>, vector<1x1x128x4xf32>
    %60 = vector.shape_cast %59 : vector<1x1x128x4xf32> to vector<128x4xf32>
    %61 = vector.shape_cast %58 : vector<128x4xf32> to vector<1x1x128x4xf32>
    tpu.vector_store %arg5[%c0_28, %c3_29, %c0_30, %c0_31], %61 {strides = array<i32>} : memref<1x4x128x4xf32, #tpu.memory_space<vmem>>, vector<1x1x128x4xf32>,
    return
  }
  func.func @transform_0(%arg0: i32, %arg1: i32) -> (i32, i32, i32, i32) {
    %c0_i32 = arith.constant 0 : i32
    %c0_i32_0 = arith.constant 0 : i32
    %c0_i32_1 = arith.constant 0 : i32
    %c0_i32_2 = arith.constant 0 : i32
    return %arg0, %c0_i32, %c0_i32_0, %c0_i32_1 : i32, i32, i32, i32
  }
  func.func @transform_1(%arg0: i32, %arg1: i32) -> (i32, i32, i32) {
    %c0_i32 = arith.constant 0 : i32
    %c0_i32_0 = arith.constant 0 : i32
    %c0_i32_1 = arith.constant 0 : i32
    %c0_i32_2 = arith.constant 0 : i32
    return %c0_i32, %c0_i32_0, %c0_i32_1 : i32, i32, i32
  }
  func.func @transform_2(%arg0: i32, %arg1: i32) -> (i32, i32) {
    %c0_i32 = arith.constant 0 : i32
    %c0_i32_0 = arith.constant 0 : i32
    %c0_i32_1 = arith.constant 0 : i32
    return %c0_i32, %c0_i32_0 : i32, i32
  }
  func.func @transform_3(%arg0: i32, %arg1: i32) -> (i32, i32, i32, i32) {
    %c0_i32 = arith.constant 0 : i32
    %c0_i32_0 = arith.constant 0 : i32
    %c0_i32_1 = arith.constant 0 : i32
    return %arg0, %c0_i32, %arg1, %c0_i32_0 : i32, i32, i32, i32
  }
}

</mosaic_0001>

<bundles_post_ra>
// kernel: upsample_forward.1
= control target key start
LH: loop header
LB: loop body
LE: loop exit
PB: predicated region body
PF: predicated region fallthrough
CT: control target
= control target key end

     0   :  { %s2050_s12 = smov 0   ;;  %s2052_s13 = smov 0   ;;  %s2826_s0 = inlined_call_operand.vmem [shape: bf16[2,18,18,4], index: 0, kind: input, shape index: {}]   ;;  %s2827_s1 = inlined_call_operand.vmem [shape: bf16[4,16,4], index: 1, kind: input, shape index: {}]   ;;  %s2828_s2 = inlined_call_operand.vmem [shape: f32[1,4], index: 2, kind: input, shape index: {}]   ;;  %s2829_s3 = inlined_call_operand.vmem [shape: f32[2,4,256,4], index: 3, kind: output, shape index: {}]  }
   0x1   :  { %s2054_s14 = smov 0   ;;  %s2056_s15 = smov 0  }
   0x2   :  { %s2058_s16 = smov 0   ;;  %s2060_s17 = smov 0  }
   0x3   :  { %s2062_s18 = smov 0  }
   0x4 LB: > { %s22_s19 = sadd.s32 1, %s2017_s16  ;;  %s25_s20 = sadd.s32 1, %s2021_s17  ;;  %s2025_s18 = sphi %s2062_s18, %s13_s18   ;;  %s2021_s17 = sphi %s2060_s17, %s2836_s17   ;;  %s2017_s16 = sphi %s2058_s16, %s2835_s16   ;;  %s2013_s15 = sphi %s2056_s15, %s2834_s15   ;;  %s2009_s14 = sphi %s2054_s14, %s2833_s14   ;;  %s2005_s13 = sphi %s2052_s13, %s2832_s13   ;;  %s2001_s12 = sphi %s2050_s12, %s2831_s12  }
   0x5   : > { %p23_p0 = scmp.ge.s32.totalorder %s22_s19, 2  ;;  %s1651_s21 = sadd.s32 4294967295, %s2025_s18  }
   0x6   : > { %p112_p1 = scmp.ne.s32.totalorder %s2005_s13, %s2001_s12  ;;  %p113_p2 = scmp.eq.s32.totalorder %s1651_s21, 3 }
   0x7   : > { %s2838_s19 = smov (%p23_p0, %s22_s19), 0  ;;  %s2840_s20 = smov (!%p23_p0, %s25_s20), %s2021_s17 }
   0x8   : > { %s98_s22 = ssub.s32 %s2017_s16, %s2838_s19  ;;  %p27_p3 = scmp.ge.s32.totalorder %s2840_s20, 2 }
   0x9   : > { %p1655_p4 = scmp.ge.s32.totalorder %s2025_s18, 1  ;;  %p2096_p5 = por %p113_p2, %p112_p1 }
   0xa   : > { %p151_p6 = scmp.lt.s32.totalorder %s2025_s18, 5  ;;  %s2842_s20 = smov (%p27_p3, %s2840_s20), 0 }
   0xb   : > { %s97_s24 = ssub.s32 %s2021_s17, %s2842_s20  ;;  %s102_s26 = sadd.s32 1, %s2005_s13 }
   0xc   : > { %p152_p7 = pnand %p1655_p4, %p151_p6  ;;  %s99_s25 = sor.u32 %s98_s22, %s97_s24 }
   0xd   : > { %p100_p8 = scmp.eq.s32.totalorder %s99_s25, 0  ;;  %p174_p9 = scmp.lt.s32.totalorder (!%p152_p7), %s2013_s15, 1  ;;  %vm280_vm0 = vsmask.f32 (!%p152_p7), 7424  ;;  %v1967_v38 = vld [vmem:[%s2827_s1] sm:$0xff] (!%p152_p7)   ;;  %v1968_v41 = vld [vmem:[%s2827_s1 + $0x8] sm:$0xff] (!%p152_p7)  }
   0xe   : > { %155 = sbr.rel (%p152_p7) target bundleno = 509 (0x1fd), region = 32  ;;  %s2027_s8 = smov (!%p152_p7), 8   ;;  %1815 = vmatprep.subr.bf16.mxu0 (!%p152_p7), %v1967_v38  ;;  %1833 = vmatprep.subr.bf16.mxu1 (!%p152_p7), %v1968_v41  ;;  %vm445_vm1 = vcmask (!%p152_p7), 31744   ;;  %vm462_vm2 = vcmask (!%p152_p7), 64512   ;;  %vm479_vm3 = vcmask (!%p152_p7), 97280   ;;  %vm510_vm4 = vcmask (!%p152_p7), 130048  }
   0xf   : > { %s2107_s27 = scalar_select %p100_p8, %s2005_s13, %s102_s26  }
  0x10   : > { %s1778_s29 = smul.u32 (!%p152_p7), 96, %s2009_s14  ;;  %s2028_s9 = smov (!%p152_p7), 4   ;;  %1816 = vmatpush3.bf16.msra.mxu0 (!%p152_p7), %v1967_v38  ;;  %1834 = vmatpush3.bf16.msra.mxu1 (!%p152_p7), %v1968_v41 }
  0x11   : > { %s2029_s10 = smov (!%p152_p7), 12  }
  0x15   : > { %s175_s28 = scalar_select %p174_p9, %s2013_s15, 1 }
  0x17   : > { %s1887_s30 = smul.u32 216, %s175_s28 }
  0x19   : > { %s178_s6 = scalar_lea.vmem %s2826_s0, %s1887_s30  ;;  %s171_s30 = sand.u32 1, %s2001_s12  }
  0x1a   : > { %s2115_s7 = scalar_lea.vmem %s178_s6, %s1778_s29  ;;  %s1656_s4 = sshll.u32 %s171_s30, 9 }
  0x1b   : > { %v2118_v0 = vld [vmem:[%s2115_s7 + $0xc] sm:$0xff]   ;;  %v2121_v1 = vld [vmem:[%s2115_s7 + $0x14] ss:$0 sps:$4 sm:$0x11]   ;;  %v2124_v2 = vld [vmem:[%s2115_s7 + $0x18] sm:$0xff]   ;;  %s1773_s12 = sshll.u32 (%p2096_p5), %s2009_s14, 4 }
  0x1c   : > { %398 = vrot.lane.b32.xlu1 %v2118_v0, %s2027_s8  ;;  %672 = vrot.lane.b32.xlu0 %v2121_v1, %s2027_s8  ;;  %v2131_v3 = vld [vmem:[%s2115_s7] sm:$0xff]   ;;  %v2134_v4 = vld [vmem:[%s2115_s7 + $0x8] ss:$0 sps:$4 sm:$0x11]   ;;  %v296_v5 = vshll.u32 %v2118_v0, 16  ;;  %v294_v8 = vshrl.u32 %v2118_v0, 16 }
  0x1d   : > { %v282_v6 = vshrl.u32 %v2131_v3, 16  ;;  %v284_v7 = vshll.u32 %v2131_v3, 16  ;;  %v301_v9 = vshll.u32 %v2121_v1, 16  ;;  %v289_v10 = vshll.u32 %v2134_v4, 16  ;;  %v2146_v14 = vld [vmem:[%s2115_s7 + $0x24] sm:$0xff]   ;;  %v2180_v40 = vld [vmem:[%s2115_s7 + $0x30] sm:$0xff]  }
  0x1e   : > { %v640_v11 = vshrl.u32 %v2134_v4, 16  ;;  %v298_v12 = vrot.slane %v296_v5, 1  ;;  %v2149_v19 = vld [vmem:[%s2115_s7 + $0x20] ss:$0 sps:$4 sm:$0x11]   ;;  %v308_v20 = vshll.u32 %v2124_v2, 16 }
  0x1f   : > { %v286_v13 = vrot.slane %v284_v7, 1  ;;  %v291_v15 = vrot.slane %v289_v10, 1  ;;  %v303_v18 = vrot.slane %v301_v9, 1  ;;  %v642_v21 = vshrl.u32 %v2121_v1, 16  ;;  %v2193_v44 = vld [vmem:[%s2115_s7 + $0x3c] sm:$0xff]   ;;  %v2221_v61 = vld [vmem:[%s2115_s7 + $0x48] sm:$0xff]  }
  0x20   : > { %400 = vrot.lane.b32.xlu1 %v2124_v2, %s2027_s8  ;;  %v299_v17 = vor.u32 %v298_v12, %v294_v8  ;;  %v2156_v23 = vld [vmem:[%s2115_s7 + $0x2c] ss:$0 sps:$4 sm:$0x11]   ;;  %v320_v24 = vshll.u32 %v2146_v14, 16  ;;  %v306_v25 = vshrl.u32 %v2124_v2, 16  ;;  %v310_v27 = vrot.slane %v308_v20, 1 }
  0x21   : > { %v287_v16 = vor.u32 %v286_v13, %v282_v6  ;;  %v313_v28 = vshll.u32 %v2149_v19, 16  ;;  %v318_v29 = vshrl.u32 %v2146_v14, 16  ;;  %v325_v31 = vshll.u32 %v2156_v23, 16  ;;  %v2187_v42 = vld [vmem:[%s2115_s7 + $0x38] ss:$0 sps:$4 sm:$0x11]  }
  0x22   : > { %v304_v26 = vsel %vm280_vm0, %v299_v17, %v303_v18  ;;  %v322_v30 = vrot.slane %v320_v24, 1  ;;  %v311_v32 = vor.u32 %v310_v27, %v306_v25  ;;  %v644_v34 = vshrl.u32 %v2149_v19, 16  ;;  %v2201_v49 = vld [vmem:[%s2115_s7 + $0x44] ss:$0 sps:$4 sm:$0x11]   ;;  %v2231_v5 = vld [vmem:[%s2115_s7 + $0x54] sm:$0xff]  }
  0x23   : > { %v292_v22 = vsel %vm280_vm0, %v287_v16, %v291_v15  ;;  %v315_v33 = vrot.slane %v313_v28, 1  ;;  %v327_v36 = vrot.slane %v325_v31, 1  ;;  %v332_v43 = vshll.u32 %v2180_v40, 16  ;;  %v2225_v62 = vld [vmem:[%s2115_s7 + $0x50] ss:$0 sps:$4 sm:$0x11]  }
  0x24   : > { %656 = vrot.lane.b32.xlu1 %v640_v11, %s2028_s9  ;;  %377 = vrot.lane.b32.xlu0 %v292_v22, %s2028_s9  ;;  %v323_v35 = vor.u32 %v322_v30, %v318_v29  ;;  %v330_v45 = vshrl.u32 %v2180_v40, 16  ;;  %v337_v47 = vshll.u32 %v2187_v42, 16  ;;  %v646_v48 = vshrl.u32 %v2156_v23, 16  ;;  %v2239_v10 = vld [vmem:[%s2115_s7 + $0x5c] ss:$0 sps:$4 sm:$0x11]  }
  0x25   : > { %v316_v37 = vsel %vm280_vm0, %v311_v32, %v315_v33  ;;  %v334_v46 = vrot.slane %v332_v43, 1  ;;  %v344_v50 = vshll.u32 %v2193_v44, 16  ;;  %v342_v53 = vshrl.u32 %v2193_v44, 16  ;;  %v2256_v24 = vld [vmem:[%s2827_s1 + $0x10] sm:$0xff]   ;;  %v2261_v25 = vld [vmem:[%s2827_s1 + $0x18] sm:$0xff]   ;;  %v2271_v27 = vld [vmem:[%s2115_s7 + $0x60] sm:$0xff]  }
  0x26   : > { %v328_v39 = vsel %vm280_vm0, %v323_v35, %v327_v36  ;;  %v339_v52 = vrot.slane %v337_v47, 1  ;;  %v349_v55 = vshll.u32 %v2201_v49, 16  ;;  %v648_v57 = vshrl.u32 %v2187_v42, 16  ;;  %1851 = vmatprep.subr.bf16.mxu0 %v2256_v24  ;;  %1869 = vmatprep.subr.bf16.mxu1 %v2261_v25  ;;  %v2275_v28 = vld [vmem:[%s2115_s7 + $0x68] ss:$0 sps:$4 sm:$0x11]  }
  0x27   : > { %v335_v51 = vor.u32 %v334_v46, %v330_v45  ;;  %v346_v54 = vrot.slane %v344_v50, 1  ;;  %v356_v63 = vshll.u32 %v2221_v61, 16  ;;  %v354_v6 = vshrl.u32 %v2221_v61, 16  ;;  %v1966_v41 = vld [vmem:[%s2115_s7 + $0x74] ss:$0 sps:$4 sm:$0x11]  }
  0x28   : > { %658 = vrot.lane.b32.xlu1 %v642_v21, %s2028_s9  ;;  %379 = vrot.lane.b32.xlu0 %v304_v26, %s2028_s9  ;;  %v351_v59 = vrot.slane %v349_v55, 1  ;;  %v361_v8 = vshll.u32 %v2225_v62, 16  ;;  %v650_v9 = vshrl.u32 %v2201_v49, 16  ;;  %v368_v11 = vshll.u32 %v2231_v5, 16 }
  0x29   : > { %v340_v56 = vsel %vm280_vm0, %v335_v51, %v339_v52  ;;  %v347_v58 = vor.u32 %v346_v54, %v342_v53  ;;  %v358_v7 = vrot.slane %v356_v63, 1  ;;  %v366_v15 = vshrl.u32 %v2231_v5, 16 }
  0x2a   : > { %v363_v13 = vrot.slane %v361_v8, 1  ;;  %v370_v16 = vrot.slane %v368_v11, 1  ;;  %v373_v17 = vshll.u32 %v2239_v10, 16  ;;  %v652_v20 = vshrl.u32 %v2225_v62, 16 }
  0x2b   : > { %v352_v60 = vsel %vm280_vm0, %v347_v58, %v351_v59  ;;  %v359_v12 = vor.u32 %v358_v7, %v354_v6  ;;  %v420_v29 = vshll.u32 %v2271_v27, 16  ;;  %v418_v30 = vshrl.u32 %v2271_v27, 16 }
  0x2c   : > { %674 = vrot.lane.b32.xlu1 %v2149_v19, %s2027_s8  ;;  %429 = vrot.lane.b32.xlu0 %v304_v26, %s2029_s10  ;;  %v375_v22 = vrot.slane %v373_v17, 1  ;;  %v425_v32 = vshll.u32 %v2275_v28, 16  ;;  %v654_v33 = vshrl.u32 %v2239_v10, 16  ;;  %v688_v38 = vshrl.u32 %v2275_v28, 16 }
  0x2d   : > { %v364_v18 = vsel %vm280_vm0, %v359_v12, %v363_v13  ;;  %v422_v31 = vrot.slane %v420_v29, 1  ;;  %v1001_v46 = vshll.u32 %v1966_v41, 16  ;;  %v1142_v50 = vshrl.u32 %v1966_v41, 16 }
  0x2e   : > { %v427_v35 = vrot.slane %v425_v32, 1 }
  0x30   : > { %692 = vrot.lane.b32.xlu1 %v644_v34, %s2029_s10  ;;  %431 = vrot.lane.b32.xlu0 %v316_v37, %s2029_s10 }
  0x34   : > { %383 = vrot.lane.b32.xlu1 %v328_v39, %s2028_s9  ;;  %690 = vrot.lane.b32.xlu0 %v642_v21, %s2029_s10  ;;  %v371_v21 = vor.u32 %v370_v16, %v366_v15 }
  0x36   : > { %v376_v26 = vsel %vm280_vm0, %v371_v21, %v375_v22 }
  0x38   : > { %404 = vrot.lane.b32.xlu1 %v2180_v40, %s2027_s8  ;;  %381 = vrot.lane.b32.xlu0 %v316_v37, %s2028_s9  ;;  %v1965_v37 = vld [vmem:[%s2115_s7 + $0x6c] sm:$0xff]   ;;  %s2476_s7 = scalar_lea.vmem [#allocation2], %s1656_s4 }
  0x39   : > { %v994_v43 = vshrl.u32 %v1965_v37, 16 }
  0x3c   : > { %660 = vrot.lane.b32.xlu1 %v644_v34, %s2028_s9  ;;  %402 = vrot.lane.b32.xlu0 %v2146_v14, %s2027_s8  ;;  %v423_v34 = vor.u32 %v422_v31, %v418_v30 }
  0x3e   : > { %v428_v36 = vsel %vm280_vm0, %v423_v34, %v427_v35 }
  0x40   : > { %662 = vrot.lane.b32.xlu1 %v646_v48, %s2028_s9  ;;  %433 = vrot.lane.b32.xlu0 %v328_v39, %s2029_s10  ;;  %v996_v39 = vshll.u32 %v1965_v37, 16 }
  0x42   : > { %v998_v45 = vrot.slane %v996_v39, 1 }
  0x44   : > { %678 = vrot.lane.b32.xlu1 %v2187_v42, %s2027_s8  ;;  %435 = vrot.lane.b32.xlu0 %v340_v56, %s2029_s10  ;;  %v999_v47 = vor.u32 %v998_v45, %v994_v43 }
  0x48   : > { %696 = vrot.lane.b32.xlu1 %v648_v57, %s2029_s10  ;;  %676 = vrot.lane.b32.xlu0 %v2156_v23, %s2027_s8 }
  0x4c   : > { %387 = vrot.lane.b32.xlu1 %v352_v60, %s2028_s9  ;;  %694 = vrot.lane.b32.xlu0 %v646_v48, %s2029_s10  ;;  %v1003_v48 = vrot.slane %v1001_v46, 1 }
  0x4e   : > { %v1004_v51 = vsel %vm280_vm0, %v999_v47, %v1003_v48 }
  0x50   : > { %408 = vrot.lane.b32.xlu1 %v2221_v61, %s2027_s8  ;;  %385 = vrot.lane.b32.xlu0 %v340_v56, %s2028_s9 }
  0x54   : > { %664 = vrot.lane.b32.xlu1 %v648_v57, %s2028_s9  ;;  %406 = vrot.lane.b32.xlu0 %v2193_v44, %s2027_s8 }
  0x58   : > { %666 = vrot.lane.b32.xlu1 %v650_v9, %s2028_s9  ;;  %437 = vrot.lane.b32.xlu0 %v352_v60, %s2029_s10 }
  0x5c   : > { %682 = vrot.lane.b32.xlu1 %v2225_v62, %s2027_s8  ;;  %439 = vrot.lane.b32.xlu0 %v364_v18, %s2029_s10 }
  0x60   : > { %700 = vrot.lane.b32.xlu1 %v652_v20, %s2029_s10  ;;  %680 = vrot.lane.b32.xlu0 %v2201_v49, %s2027_s8 }
  0x64   : > { %391 = vrot.lane.b32.xlu1 %v376_v26, %s2028_s9  ;;  %698 = vrot.lane.b32.xlu0 %v650_v9, %s2029_s10 }
  0x68   : > { %412 = vrot.lane.b32.xlu1 %v2271_v27, %s2027_s8  ;;  %389 = vrot.lane.b32.xlu0 %v364_v18, %s2028_s9 }
  0x6c   : > { %668 = vrot.lane.b32.xlu1 %v652_v20, %s2028_s9  ;;  %410 = vrot.lane.b32.xlu0 %v2231_v5, %s2027_s8 }
  0x70   : > { %670 = vrot.lane.b32.xlu1 %v654_v33, %s2028_s9  ;;  %441 = vrot.lane.b32.xlu0 %v376_v26, %s2029_s10 }
  0x74   : > { %686 = vrot.lane.b32.xlu1 %v2275_v28, %s2027_s8  ;;  %443 = vrot.lane.b32.xlu0 %v428_v36, %s2029_s10 }
  0x78   : > { %704 = vrot.lane.b32.xlu1 %v688_v38, %s2029_s10  ;;  %684 = vrot.lane.b32.xlu0 %v2239_v10, %s2027_s8 }
  0x7c   : > { %988 = vrot.lane.b32.xlu1 %v1965_v37, %s2027_s8  ;;  %702 = vrot.lane.b32.xlu0 %v654_v33, %s2029_s10 }
  0x80   : > { %1138 = vrot.lane.b32.xlu1 %v688_v38, %s2028_s9  ;;  %981 = vrot.lane.b32.xlu0 %v428_v36, %s2028_s9 }
  0x84   : > { %1144 = vrot.lane.b32.xlu1 %v1142_v50, %s2029_s10  ;;  %1005 = vrot.lane.b32.xlu0 %v1004_v51, %s2029_s10 }
  0x88   : > { %1140 = vrot.lane.b32.xlu0 %v1966_v41, %s2027_s8  ;;  %s1774_s8 = sshll.u32 (%p2096_p5), %s2013_s15, 7 }
  0x89   : > { %s1297_s23 = sadd.s32 (%p2096_p5), %s1774_s8, %s1773_s12 }
  0x8a   : > { %s1775_s9 = sshll.u32 (%p2096_p5), %s1297_s23, 3 }
  0x8b   : > { %s2684_s21 = scalar_lea.vmem (%p2096_p5), %s2829_s3, %s1775_s9 }
  0x8e   : > { %v399_v52 = vpop.permute.xlu1 %398  ;;  %v673_v53 = vpop.permute.xlu0 %672 }
  0x92   : > { %v401_v54 = vpop.permute.xlu1 %400 }
  0x96   : > { %v657_v55 = vpop.permute.xlu1 %656  ;;  %v378_v56 = vpop.permute.xlu0 %377 }
  0x97   : > { %v447_v59 = vsel %vm445_vm1, %v2131_v3, %v378_v56 }
  0x98   : > { %v464_v7 = vsel %vm462_vm2, %v447_v59, %v399_v52 }
  0x9a   : > { %v659_v57 = vpop.permute.xlu1 %658  ;;  %v380_v58 = vpop.permute.xlu0 %379 }
  0x9b   : > { %v709_v63 = vsel %vm445_vm1, %v2121_v1, %v659_v57  ;;  %v449_v8 = vsel %vm445_vm1, %v2118_v0, %v380_v58  ;;  %v707_v1 = vsel %vm445_vm1, %v2134_v4, %v657_v55 }
  0x9c   : > { %v466_v13 = vsel %vm462_vm2, %v449_v8, %v401_v54  ;;  %v723_v26 = vsel %vm462_vm2, %v707_v1, %v673_v53 }
  0x9e   : > { %v675_v60 = vpop.permute.xlu1 %674  ;;  %v430_v6 = vpop.permute.xlu0 %429 }
  0x9f   : > { %v481_v9 = vsel %vm479_vm3, %v464_v7, %v430_v6  ;;  %v725_v3 = vsel %vm462_vm2, %v709_v63, %v675_v60 }
  0xa0   : > { %1817 = vmatprep.mubr.msk.bf16.mxu0 %vm510_vm4, %v481_v9  ;;  %v756_v12 = vshll.u32 %v481_v9, 16  ;;  %v754_v31 = vshrl.u32 %v481_v9, 16 }
  0xa2   : > { %v693_v11 = vpop.permute.xlu1 %692  ;;  %v432_v15 = vpop.permute.xlu0 %431  ;;  %v758_v21 = vrot.slane %v756_v12, 1 }
  0xa3   : > { %v741_v16 = vsel %vm479_vm3, %v725_v3, %v693_v11  ;;  %v2322_v17 = vsel %vm479_vm3, %v466_v13, %v432_v15 }
  0xa4   : > { %v766_v0 = vshll.u32 %v2322_v17, 16  ;;  %1818 = vmatmul.mubr.msk.bf16.vlgmr.msra.gmra.mrb[0].mxu0 %vm510_vm4, %v2322_v17  ;;  %v770_v20 = vshll.u32 %v741_v16, 16  ;;  %v764_v30 = vshrl.u32 %v2322_v17, 16  ;;  %v759_v38 = vor.u32 %v758_v21, %v754_v31 }
  0xa5   : > { %1852 = vmatpush3.bf16.msra.mxu0 %v2256_v24 }
  0xa6   : > { %v384_v18 = vpop.permute.xlu1 %383  ;;  %v768_v22 = vrot.slane %v766_v0, 1  ;;  %v691_v29 = vpop.permute.xlu0 %690  ;;  %v772_v35 = vrot.slane %v770_v20, 1 }
  0xa7   : > { %v739_v4 = vsel %vm479_vm3, %v723_v26, %v691_v29  ;;  %v453_v50 = vsel %vm445_vm1, %v2146_v14, %v384_v18 }
  0xa8   : > { %v760_v32 = vshll.u32 %v739_v4, 16  ;;  %v769_v34 = vor.u32 %v768_v22, %v764_v30 }
  0xaa   : > { %v405_v33 = vpop.permute.xlu1 %404  ;;  %v762_v36 = vrot.slane %v760_v32, 1  ;;  %v382_v37 = vpop.permute.xlu0 %381  ;;  %v2334_v41 = vsel %vm280_vm0, %v769_v34, %v772_v35 }
  0xab   : > { %v451_v46 = vsel %vm445_vm1, %v2124_v2, %v382_v37  ;;  %v470_v53 = vsel %vm462_vm2, %v453_v50, %v405_v33 }
  0xac   : > { %v763_v39 = vsel %vm280_vm0, %v759_v38, %v762_v36 }
  0xad   : > { %1835 = vmatprep.mubr.msk.bf16.mxu1 %vm510_vm4, %v763_v39 }
  0xae   : > { %v661_v24 = vpop.permute.xlu1 %660  ;;  %1836 = vmatmul.mubr.msk.bf16.vlgmr.msra.gmra.mrb[0].mxu1 %vm510_vm4, %v2334_v41  ;;  %v403_v43 = vpop.permute.xlu0 %402 }
  0xaf   : > { %1870 = vmatpush3.bf16.msra.mxu1 %v2261_v25  ;;  %v468_v47 = vsel %vm462_vm2, %v451_v46, %v403_v43 }
  0xb2   : > { %v663_v45 = vpop.permute.xlu1 %662  ;;  %v434_v48 = vpop.permute.xlu0 %433 }
  0xb3   : > { %v2345_v51 = vsel %vm479_vm3, %v468_v47, %v434_v48  ;;  %v713_v25 = vsel %vm445_vm1, %v2156_v23, %v663_v45  ;;  %v711_v23 = vsel %vm445_vm1, %v2149_v19, %v661_v24 }
  0xb4   : > { %1821 = vmatprep.mubr.msk.bf16.mxu0 %vm510_vm4, %v2345_v51  ;;  %v776_v56 = vshll.u32 %v2345_v51, 16  ;;  %v774_v3 = vshrl.u32 %v2345_v51, 16 }
  0xb6   : > { %v679_v52 = vpop.permute.xlu1 %678  ;;  %v436_v54 = vpop.permute.xlu0 %435  ;;  %v778_v6 = vrot.slane %v776_v56, 1 }
  0xb7   : > { %v2353_v2 = vsel %vm479_vm3, %v470_v53, %v436_v54  ;;  %v729_v55 = vsel %vm462_vm2, %v713_v25, %v679_v52 }
  0xb8   : > { %1822 = vmatmul.mubr.msk.bf16.gmra.mrb[4].mxu0 %vm510_vm4, %v2353_v2  ;;  %v786_v59 = vshll.u32 %v2353_v2, 16  ;;  %v784_v15 = vshrl.u32 %v2353_v2, 16  ;;  %v779_v1 = vor.u32 %v778_v6, %v774_v3 }
  0xba   : > { %v697_v14 = vpop.permute.xlu1 %696  ;;  %v677_v57 = vpop.permute.xlu0 %676  ;;  %v788_v9 = vrot.slane %v786_v59, 1 }
  0xbb   : > { %v745_v58 = vsel %vm479_vm3, %v729_v55, %v697_v14  ;;  %v727_v7 = vsel %vm462_vm2, %v711_v23, %v677_v57 }
  0xbc   : > { %v790_v63 = vshll.u32 %v745_v58, 16  ;;  %v789_v20 = vor.u32 %v788_v9, %v784_v15 }
  0xbe   : > { %v388_v60 = vpop.permute.xlu1 %387  ;;  %v695_v8 = vpop.permute.xlu0 %694  ;;  %v792_v16 = vrot.slane %v790_v63, 1 }
  0xbf   : > { %v743_v11 = vsel %vm479_vm3, %v727_v7, %v695_v8  ;;  %v457_v32 = vsel %vm445_vm1, %v2193_v44, %v388_v60 }
  0xc0   : > { %v780_v12 = vshll.u32 %v743_v11, 16  ;;  %v2373_v22 = vsel %vm280_vm0, %v789_v20, %v792_v16 }
  0xc2   : > { %v409_v13 = vpop.permute.xlu1 %408  ;;  %v782_v0 = vrot.slane %v780_v12, 1  ;;  %v386_v18 = vpop.permute.xlu0 %385 }
  0xc3   : > { %v455_v30 = vsel %vm445_vm1, %v2180_v40, %v386_v18  ;;  %v474_v35 = vsel %vm462_vm2, %v457_v32, %v409_v13 }
  0xc4   : > { %v2368_v19 = vsel %vm280_vm0, %v779_v1, %v782_v0 }
  0xc5   : > { %1839 = vmatprep.mubr.msk.bf16.mxu1 %vm510_vm4, %v2368_v19 }
  0xc6   : > { %v665_v21 = vpop.permute.xlu1 %664  ;;  %1840 = vmatmul.mubr.msk.bf16.gmra.mrb[4].mxu1 %vm510_vm4, %v2373_v22  ;;  %v407_v26 = vpop.permute.xlu0 %406 }
  0xc7   : > { %v472_v4 = vsel %vm462_vm2, %v455_v30, %v407_v26 }
  0xca   : > { %v667_v29 = vpop.permute.xlu1 %666  ;;  %v438_v31 = vpop.permute.xlu0 %437 }
  0xcb   : > { %v2383_v33 = vsel %vm479_vm3, %v472_v4, %v438_v31  ;;  %v717_v36 = vsel %vm445_vm1, %v2201_v49, %v667_v29  ;;  %v715_v49 = vsel %vm445_vm1, %v2187_v42, %v665_v21 }
  0xcc   : > { %1825 = vmatprep.mubr.msk.bf16.mxu0 %vm510_vm4, %v2383_v33  ;;  %v796_v39 = vshll.u32 %v2383_v33, 16  ;;  %v794_v54 = vshrl.u32 %v2383_v33, 16 }
  0xce   : > { %v683_v34 = vpop.permute.xlu1 %682  ;;  %v440_v37 = vpop.permute.xlu0 %439  ;;  %v798_v48 = vrot.slane %v796_v39, 1 }
  0xcf   : > { %v2391_v40 = vsel %vm479_vm3, %v474_v35, %v440_v37  ;;  %v733_v38 = vsel %vm462_vm2, %v717_v36, %v683_v34 }
  0xd0   : > { %1826 = vmatmul.mubr.msk.bf16.gmra.mrb[8].mxu0 %vm510_vm4, %v2391_v40  ;;  %v806_v45 = vshll.u32 %v2391_v40, 16  ;;  %v804_v56 = vshrl.u32 %v2391_v40, 16  ;;  %v799_v58 = vor.u32 %v798_v48, %v794_v54 }
  0xd2   : > { %v701_v44 = vpop.permute.xlu1 %700  ;;  %v681_v24 = vpop.permute.xlu0 %680  ;;  %v808_v53 = vrot.slane %v806_v45, 1 }
  0xd3   : > { %v749_v43 = vsel %vm479_vm3, %v733_v38, %v701_v44  ;;  %v731_v50 = vsel %vm462_vm2, %v715_v49, %v681_v24 }
  0xd4   : > { %v810_v47 = vshll.u32 %v749_v43, 16  ;;  %v809_v23 = vor.u32 %v808_v53, %v804_v56 }
  0xd6   : > { %v392_v46 = vpop.permute.xlu1 %391  ;;  %v699_v52 = vpop.permute.xlu0 %698  ;;  %v812_v57 = vrot.slane %v810_v47, 1 }
  0xd7   : > { %v747_v25 = vsel %vm479_vm3, %v731_v50, %v699_v52  ;;  %v461_v12 = vsel %vm445_vm1, %v2231_v5, %v392_v46 }
  0xd8   : > { %v800_v14 = vshll.u32 %v747_v25, 16  ;;  %v813_v6 = vsel %vm280_vm0, %v809_v23, %v812_v57 }
  0xda   : > { %v413_v55 = vpop.permute.xlu1 %412  ;;  %v802_v59 = vrot.slane %v800_v14, 1  ;;  %v390_v60 = vpop.permute.xlu0 %389  ;;  %v2472_v14 = vld [vmem:[%s2828_s2] ss:$0 sm:$0xff] }
  0xdb   : > { %v459_v9 = vsel %vm445_vm1, %v2221_v61, %v390_v60  ;;  %v478_v16 = vsel %vm462_vm2, %v461_v12, %v413_v55 }
  0xdc   : > { %v2406_v42 = vsel %vm280_vm0, %v799_v58, %v802_v59 }
  0xdd   : > { %1843 = vmatprep.mubr.msk.bf16.mxu1 %vm510_vm4, %v2406_v42 }
  0xde   : > { %v669_v63 = vpop.permute.xlu1 %668  ;;  %1844 = vmatmul.mubr.msk.bf16.gmra.mrb[8].mxu1 %vm510_vm4, %v813_v6  ;;  %v411_v7 = vpop.permute.xlu0 %410 }
  0xdf   : > { %v476_v11 = vsel %vm462_vm2, %v459_v9, %v411_v7  ;;  %v719_v30 = vsel %vm445_vm1, %v2225_v62, %v669_v63 }
  0xe2   : > { %v671_v8 = vpop.permute.xlu1 %670  ;;  %v442_v3 = vpop.permute.xlu0 %441 }
  0xe3   : > { %v493_v13 = vsel %vm479_vm3, %v476_v11, %v442_v3  ;;  %v721_v1 = vsel %vm445_vm1, %v2239_v10, %v671_v8 }
  0xe4   : > { %1829 = vmatprep.mubr.msk.bf16.mxu0 %vm510_vm4, %v493_v13  ;;  %v816_v5 = vshll.u32 %v493_v13, 16  ;;  %v814_v36 = vshrl.u32 %v493_v13, 16 }
  0xe6   : > { %v687_v15 = vpop.permute.xlu1 %686  ;;  %v444_v0 = vpop.permute.xlu0 %443  ;;  %v818_v4 = vrot.slane %v816_v5, 1 }
  0xe7   : > { %v495_v18 = vsel %vm479_vm3, %v478_v16, %v444_v0  ;;  %v737_v20 = vsel %vm462_vm2, %v721_v1, %v687_v15 }
  0xe8   : > { %1830 = vmatmul.mubr.msk.bf16.gmra.mrb[12].mxu0 %vm510_vm4, %v495_v18  ;;  %v826_v29 = vshll.u32 %v495_v18, 16  ;;  %v819_v38 = vor.u32 %v818_v4, %v814_v36 }
  0xe9   : > { %1853 = vmatprep.mubr.msk.bf16.mxu0 %vm510_vm4, %v2322_v17  ;;  %v824_v17 = vshrl.u32 %v495_v18, 16 }
  0xea   : > { %v705_v61 = vpop.permute.xlu1 %704  ;;  %v685_v21 = vpop.permute.xlu0 %684  ;;  %v828_v34 = vrot.slane %v826_v29, 1 }
  0xeb   : > { %v753_v26 = vsel %vm479_vm3, %v737_v20, %v705_v61  ;;  %v735_v31 = vsel %vm462_vm2, %v719_v30, %v685_v21 }
  0xec   : > { %v830_v10 = vshll.u32 %v753_v26, 16  ;;  %v829_v39 = vor.u32 %v828_v34, %v824_v17 }
  0xee   : > { %v703_v32 = vpop.permute.xlu0 %702  ;;  %v832_v44 = vrot.slane %v830_v10, 1 }
  0xef   : > { %v751_v35 = vsel %vm479_vm3, %v735_v31, %v703_v32 }
  0xf0   : > { %v820_v37 = vshll.u32 %v751_v35, 16  ;;  %1854 = vmatmul.mubr.msk.bf16.vlgmr.msra.gmra.mrb[16].mxu0 %vm510_vm4, %v2345_v51  ;;  %v833_v43 = vsel %vm280_vm0, %v829_v39, %v832_v44 }
  0xf1   : > { %1857 = vmatprep.mubr.msk.bf16.mxu0 %vm510_vm4, %v2353_v2  ;;  %v989_v2 = vpop.permute.xlu1 %988 }
  0xf2   : > { %v822_v62 = vrot.slane %v820_v37, 1  ;;  %v982_v51 = vpop.permute.xlu0 %981 }
  0xf3   : > { %v1008_v46 = vsel %vm445_vm1, %v2271_v27, %v982_v51 }
  0xf4   : > { %v823_v24 = vsel %vm280_vm0, %v819_v38, %v822_v62 }
  0xf5   : > { %1847 = vmatprep.mubr.msk.bf16.mxu1 %vm510_vm4, %v823_v24 }
  0xf6   : > { %1848 = vmatmul.mubr.msk.bf16.gmra.mrb[12].mxu1 %vm510_vm4, %v833_v43  ;;  %v1006_v45 = vpop.permute.xlu0 %1005 }
  0xf7   : > { %1871 = vmatprep.mubr.msk.bf16.mxu1 %vm510_vm4, %v2334_v41  ;;  %v1139_v41 = vpop.permute.xlu1 %1138 }
  0xf8   : > { %1858 = vmatmul.mubr.msk.bf16.gmra.mrb[20].mxu0 %vm510_vm4, %v2383_v33  ;;  %v1010_v33 = vsel %vm462_vm2, %v1008_v46, %v989_v2 }
  0xf9   : > { %1861 = vmatprep.mubr.msk.bf16.mxu0 %vm510_vm4, %v2391_v40  ;;  %v1147_v40 = vsel %vm445_vm1, %v2275_v28, %v1139_v41 }
  0xfa   : > { %v1141_v49 = vpop.permute.xlu0 %1140 }
  0xfb   : > { %v1149_v27 = vsel %vm462_vm2, %v1147_v40, %v1141_v49 }
  0xfe   : > { %1872 = vmatmul.mubr.msk.bf16.vlgmr.msra.gmra.mrb[16].mxu1 %vm510_vm4, %v2368_v19  ;;  %v1012_v19 = vsel %vm479_vm3, %v1010_v33, %v1006_v45 }
  0xff   : > { %1875 = vmatprep.mubr.msk.bf16.mxu1 %vm510_vm4, %v2373_v22  ;;  %v1145_v22 = vpop.permute.xlu1 %1144  ;;  %v1154_v47 = vshll.u32 %v1012_v19, 16  ;;  %v1152_v50 = vshrl.u32 %v1012_v19, 16 }
 0x100   : > { %1862 = vmatmul.mubr.msk.bf16.gmra.mrb[24].mxu0 %vm510_vm4, %v493_v13  ;;  %v1151_v48 = vsel %vm479_vm3, %v1149_v27, %v1145_v22 }
 0x101   : > { %1865 = vmatprep.mubr.msk.bf16.mxu0 %vm510_vm4, %v495_v18  ;;  %v1156_v52 = vrot.slane %v1154_v47, 1  ;;  %v1158_v28 = vshll.u32 %v1151_v48, 16 }
 0x103   : > { %v1157_v53 = vor.u32 %v1156_v52, %v1152_v50  ;;  %v1160_v25 = vrot.slane %v1158_v28, 1 }
 0x105   : > { %v1161_v54 = vsel %vm280_vm0, %v1157_v53, %v1160_v25 }
 0x106   : > { %1876 = vmatmul.mubr.msk.bf16.gmra.mrb[20].mxu1 %vm510_vm4, %v2406_v42 }
 0x107   : > { %1879 = vmatprep.mubr.msk.bf16.mxu1 %vm510_vm4, %v813_v6 }
 0x108   : > { %1866 = vmatmul.mubr.msk.bf16.gmra.mrb[28].mxu0 %vm510_vm4, %v1012_v19 }
 0x10e   : > { %1880 = vmatmul.mubr.msk.bf16.gmra.mrb[24].mxu1 %vm510_vm4, %v823_v24 }
 0x10f   : > { %1883 = vmatprep.mubr.msk.bf16.mxu1 %vm510_vm4, %v833_v43 }
 0x116   : > { %1884 = vmatmul.mubr.msk.bf16.gmra.mrb[28].mxu1 %vm510_vm4, %v1161_v54 }
 0x177   : > { %v1819_v55 = vpop.f32.mrb[0].mxu0 }
 0x178   : > { %v570_v56 = vadd.f32 %v1819_v55, %v2472_v14  ;;  %v561_v57 = vpop.f32.mrb[1].mxu0 }
 0x179   : > { %v562_v58 = vadd.f32 %v2472_v14, %v561_v57  ;;  %v1820_v59 = vpop.f32.mrb[2].mxu0 }
 0x17a   : > { %626 = vst.msk [vmem:[%s2476_s7 + $0x10] sm:$0xff] %vm445_vm1, %v570_v56  ;;  %v573_v60 = vadd.f32 %v1820_v59, %v2472_v14  ;;  %v564_v23 = vpop.f32.mrb[3].mxu0 }
 0x17b   : > { %624 = vst.msk [vmem:[%s2476_s7] sm:$0xff] %vm445_vm1, %v562_v58  ;;  %v565_v42 = vadd.f32 %v2472_v14, %v564_v23 }
 0x17c   : > { %627 = vst.msk [vmem:[%s2476_s7 + $0x18] sm:$0xff] %vm445_vm1, %v573_v60 }
 0x17d   : > { %625 = vst.msk [vmem:[%s2476_s7 + $0x8] sm:$0xff] %vm445_vm1, %v565_v42 }
 0x181   : > { %v1837_v63 = vpop.f32.mrb[0].mxu1 }
 0x182   : > { %v910_v6 = vadd.f32 %v1837_v63, %v2472_v14  ;;  %v901_v7 = vpop.f32.mrb[1].mxu1 }
 0x183   : > { %v902_v8 = vadd.f32 %v2472_v14, %v901_v7  ;;  %v1838_v9 = vpop.f32.mrb[2].mxu1 }
 0x184   : > { %1702 = vst.msk [vmem:[%s2476_s7 + $0x90] sm:$0xff] %vm445_vm1, %v910_v6  ;;  %v913_v11 = vadd.f32 %v1838_v9, %v2472_v14  ;;  %v904_v3 = vpop.f32.mrb[3].mxu1 }
 0x185   : > { %1700 = vst.msk [vmem:[%s2476_s7 + $0x80] sm:$0xff] %vm445_vm1, %v902_v8  ;;  %v905_v12 = vadd.f32 %v2472_v14, %v904_v3 }
 0x186   : > { %1703 = vst.msk [vmem:[%s2476_s7 + $0x98] sm:$0xff] %vm445_vm1, %v913_v11 }
 0x187   : > { %1701 = vst.msk [vmem:[%s2476_s7 + $0x88] sm:$0xff] %vm445_vm1, %v905_v12 }
 0x18b   : > { %v1823_v13 = vpop.f32.mrb[4].mxu0 }
 0x18c   : > { %v586_v15 = vadd.f32 %v1823_v13, %v2472_v14  ;;  %v577_v16 = vpop.f32.mrb[5].mxu0 }
 0x18d   : > { %v578_v1 = vadd.f32 %v2472_v14, %v577_v16  ;;  %v1824_v0 = vpop.f32.mrb[6].mxu0 }
 0x18e   : > { %630 = vst.msk [vmem:[%s2476_s7 + $0x30] sm:$0xff] %vm445_vm1, %v586_v15  ;;  %v589_v18 = vadd.f32 %v1824_v0, %v2472_v14  ;;  %v580_v61 = vpop.f32.mrb[7].mxu0 }
 0x18f   : > { %628 = vst.msk [vmem:[%s2476_s7 + $0x20] sm:$0xff] %vm445_vm1, %v578_v1  ;;  %v581_v20 = vadd.f32 %v2472_v14, %v580_v61 }
 0x190   : > { %631 = vst.msk [vmem:[%s2476_s7 + $0x38] sm:$0xff] %vm445_vm1, %v589_v18 }
 0x191   : > { %629 = vst.msk [vmem:[%s2476_s7 + $0x28] sm:$0xff] %vm445_vm1, %v581_v20 }
 0x199   : > { %v1841_v5 = vpop.f32.mrb[4].mxu1 }
 0x19a   : > { %v926_v21 = vadd.f32 %v1841_v5, %v2472_v14  ;;  %v917_v26 = vpop.f32.mrb[5].mxu1 }
 0x19b   : > { %v918_v29 = vadd.f32 %v2472_v14, %v917_v26  ;;  %v1842_v30 = vpop.f32.mrb[6].mxu1 }
 0x19c   : > { %1706 = vst.msk [vmem:[%s2476_s7 + $0xb0] sm:$0xff] %vm445_vm1, %v926_v21  ;;  %v929_v10 = vadd.f32 %v1842_v30, %v2472_v14  ;;  %v920_v4 = vpop.f32.mrb[7].mxu1 }
 0x19d   : > { %1704 = vst.msk [vmem:[%s2476_s7 + $0xa0] sm:$0xff] %vm445_vm1, %v918_v29  ;;  %v921_v31 = vadd.f32 %v2472_v14, %v920_v4 }
 0x19e   : > { %1707 = vst.msk [vmem:[%s2476_s7 + $0xb8] sm:$0xff] %vm445_vm1, %v929_v10 }
 0x19f   : > { %1705 = vst.msk [vmem:[%s2476_s7 + $0xa8] sm:$0xff] %vm445_vm1, %v921_v31 }
 0x1a3   : > { %v1827_v32 = vpop.f32.mrb[8].mxu0 }
 0x1a4   : > { %v602_v34 = vadd.f32 %v1827_v32, %v2472_v14  ;;  %v593_v35 = vpop.f32.mrb[9].mxu0 }
 0x1a5   : > { %v594_v36 = vadd.f32 %v2472_v14, %v593_v35  ;;  %v1828_v37 = vpop.f32.mrb[10].mxu0 }
 0x1a6   : > { %634 = vst.msk [vmem:[%s2476_s7 + $0x50] sm:$0xff] %vm445_vm1, %v602_v34  ;;  %v605_v17 = vadd.f32 %v1828_v37, %v2472_v14  ;;  %v596_v44 = vpop.f32.mrb[11].mxu0 }
 0x1a7   : > { %632 = vst.msk [vmem:[%s2476_s7 + $0x40] sm:$0xff] %vm445_vm1, %v594_v36  ;;  %v597_v38 = vadd.f32 %v2472_v14, %v596_v44 }
 0x1a8   : > { %635 = vst.msk [vmem:[%s2476_s7 + $0x58] sm:$0xff] %vm445_vm1, %v605_v17 }
 0x1a9   : > { %633 = vst.msk [vmem:[%s2476_s7 + $0x48] sm:$0xff] %vm445_vm1, %v597_v38 }
 0x1b1   : > { %v1845_v62 = vpop.f32.mrb[8].mxu1 }
 0x1b2   : > { %v942_v39 = vadd.f32 %v1845_v62, %v2472_v14  ;;  %v933_v24 = vpop.f32.mrb[9].mxu1 }
 0x1b3   : > { %v934_v43 = vadd.f32 %v2472_v14, %v933_v24  ;;  %v1846_v51 = vpop.f32.mrb[10].mxu1 }
 0x1b4   : > { %1710 = vst.msk [vmem:[%s2476_s7 + $0xd0] sm:$0xff] %vm445_vm1, %v942_v39  ;;  %v945_v2 = vadd.f32 %v1846_v51, %v2472_v14  ;;  %v936_v45 = vpop.f32.mrb[11].mxu1 }
 0x1b5   : > { %1708 = vst.msk [vmem:[%s2476_s7 + $0xc0] sm:$0xff] %vm445_vm1, %v934_v43  ;;  %v937_v46 = vadd.f32 %v2472_v14, %v936_v45 }
 0x1b6   : > { %1711 = vst.msk [vmem:[%s2476_s7 + $0xd8] sm:$0xff] %vm445_vm1, %v945_v2 }
 0x1b7   : > { %1709 = vst.msk [vmem:[%s2476_s7 + $0xc8] sm:$0xff] %vm445_vm1, %v937_v46 }
 0x1bb   : > { %v1831_v41 = vpop.f32.mrb[12].mxu0 }
 0x1bc   : > { %v618_v33 = vadd.f32 %v1831_v41, %v2472_v14  ;;  %v609_v40 = vpop.f32.mrb[13].mxu0 }
 0x1bd   : > { %v610_v49 = vadd.f32 %v2472_v14, %v609_v40  ;;  %v1832_v19 = vpop.f32.mrb[14].mxu0 }
 0x1be   : > { %638 = vst.msk [vmem:[%s2476_s7 + $0x70] sm:$0xff] %vm445_vm1, %v618_v33  ;;  %v621_v27 = vadd.f32 %v1832_v19, %v2472_v14  ;;  %v612_v22 = vpop.f32.mrb[15].mxu0 }
 0x1bf   : > { %636 = vst.msk [vmem:[%s2476_s7 + $0x60] sm:$0xff] %vm445_vm1, %v610_v49  ;;  %v613_v47 = vadd.f32 %v2472_v14, %v612_v22 }
 0x1c0   : > { %639 = vst.msk [vmem:[%s2476_s7 + $0x78] sm:$0xff] %vm445_vm1, %v621_v27 }
 0x1c1   : > { %637 = vst.msk [vmem:[%s2476_s7 + $0x68] sm:$0xff] %vm445_vm1, %v613_v47 }
 0x1c3   : > { %v1855_v48 = vpop.f32.mrb[16].mxu0 }
 0x1c4   : > { %v1067_v50 = vadd.f32 %v1855_v48, %v2472_v14  ;;  %v1058_v52 = vpop.f32.mrb[17].mxu0 }
 0x1c5   : > { %v1059_v28 = vadd.f32 %v2472_v14, %v1058_v52  ;;  %v1856_v53 = vpop.f32.mrb[18].mxu0 }
 0x1c6   : > { %1731 = vst.msk [vmem:[%s2476_s7 + $0x110] sm:$0xff] %vm445_vm1, %v1067_v50  ;;  %v1070_v25 = vadd.f32 %v1856_v53, %v2472_v14  ;;  %v1061_v54 = vpop.f32.mrb[19].mxu0 }
 0x1c7   : > { %1729 = vst.msk [vmem:[%s2476_s7 + $0x100] sm:$0xff] %vm445_vm1, %v1059_v28  ;;  %v1062_v55 = vadd.f32 %v2472_v14, %v1061_v54 }
 0x1c8   : > { %1732 = vst.msk [vmem:[%s2476_s7 + $0x118] sm:$0xff] %vm445_vm1, %v1070_v25 }
 0x1c9   : > { %1730 = vst.msk [vmem:[%s2476_s7 + $0x108] sm:$0xff] %vm445_vm1, %v1062_v55  ;;  %v1849_v56 = vpop.f32.mrb[12].mxu1 }
 0x1ca   : > { %v958_v57 = vadd.f32 %v1849_v56, %v2472_v14  ;;  %v949_v58 = vpop.f32.mrb[13].mxu1 }
 0x1cb   : > { %v950_v59 = vadd.f32 %v2472_v14, %v949_v58  ;;  %v1850_v60 = vpop.f32.mrb[14].mxu1  ;;  %v1859_v23 = vpop.f32.mrb[20].mxu0  ;;  %v1457_v58 = vld [vmem:[%s2476_s7 + $0x10] sm:$0xff] (%p2096_p5) }
 0x1cc   : > { %1714 = vst.msk [vmem:[%s2476_s7 + $0xf0] sm:$0xff] %vm445_vm1, %v958_v57  ;;  %v961_v42 = vadd.f32 %v1850_v60, %v2472_v14  ;;  %v1083_v63 = vadd.f32 %v1859_v23, %v2472_v14  ;;  %v952_v6 = vpop.f32.mrb[15].mxu1  ;;  %v1074_v7 = vpop.f32.mrb[21].mxu0  ;;  %v1455_v57 = vld [vmem:[%s2476_s7 + $0x8] sm:$0xff] (%p2096_p5)  ;;  %v1461_v60 = vld [vmem:[%s2476_s7 + $0x20] sm:$0xff] (%p2096_p5)  ;;  %1458 = vst [vmem:[%s2684_s21 + $0x10] sm:$0xff] (%p2096_p5), %v1457_v58 }
 0x1cd   : > { %1712 = vst.msk [vmem:[%s2476_s7 + $0xe0] sm:$0xff] %vm445_vm1, %v950_v59  ;;  %v953_v8 = vadd.f32 %v2472_v14, %v952_v6  ;;  %v1075_v9 = vadd.f32 %v2472_v14, %v1074_v7  ;;  %v1860_v11 = vpop.f32.mrb[22].mxu0  ;;  %v1459_v59 = vld [vmem:[%s2476_s7 + $0x18] sm:$0xff] (%p2096_p5)  ;;  %v1463_v23 = vld [vmem:[%s2476_s7 + $0x28] sm:$0xff] (%p2096_p5)  ;;  %v1469_v6 = vld [vmem:[%s2476_s7 + $0x40] sm:$0xff] (%p2096_p5) }
 0x1ce   : > { %1715 = vst.msk [vmem:[%s2476_s7 + $0xf8] sm:$0xff] %vm445_vm1, %v961_v42  ;;  %1735 = vst.msk [vmem:[%s2476_s7 + $0x130] sm:$0xff] %vm445_vm1, %v1083_v63  ;;  %v1086_v3 = vadd.f32 %v1860_v11, %v2472_v14  ;;  %v1077_v12 = vpop.f32.mrb[23].mxu0  ;;  %v1465_v42 = vld [vmem:[%s2476_s7 + $0x30] sm:$0xff] (%p2096_p5)  ;;  %v1467_v63 = vld [vmem:[%s2476_s7 + $0x38] sm:$0xff] (%p2096_p5) }
 0x1cf   : > { %1713 = vst.msk [vmem:[%s2476_s7 + $0xe8] sm:$0xff] %vm445_vm1, %v953_v8  ;;  %1733 = vst.msk [vmem:[%s2476_s7 + $0x120] sm:$0xff] %vm445_vm1, %v1075_v9  ;;  %v1078_v13 = vadd.f32 %v2472_v14, %v1077_v12  ;;  %v1471_v7 = vld [vmem:[%s2476_s7 + $0x48] sm:$0xff] (%p2096_p5)  ;;  %v1473_v8 = vld [vmem:[%s2476_s7 + $0x50] sm:$0xff] (%p2096_p5) }
 0x1d0   : > { %1736 = vst.msk [vmem:[%s2476_s7 + $0x138] sm:$0xff] %vm445_vm1, %v1086_v3  ;;  %v1475_v9 = vld [vmem:[%s2476_s7 + $0x58] sm:$0xff] (%p2096_p5)  ;;  %1456 = vst [vmem:[%s2684_s21 + $0x8] sm:$0xff] (%p2096_p5), %v1455_v57  ;;  %v1477_v11 = vld [vmem:[%s2476_s7 + $0x60] sm:$0xff] (%p2096_p5) }
 0x1d1   : > { %1734 = vst.msk [vmem:[%s2476_s7 + $0x128] sm:$0xff] %vm445_vm1, %v1078_v13  ;;  %v1873_v15 = vpop.f32.mrb[16].mxu1  ;;  %1460 = vst [vmem:[%s2684_s21 + $0x18] sm:$0xff] (%p2096_p5), %v1459_v59  ;;  %v1479_v3 = vld [vmem:[%s2476_s7 + $0x68] sm:$0xff] (%p2096_p5)  ;;  %v1481_v12 = vld [vmem:[%s2476_s7 + $0x70] sm:$0xff] (%p2096_p5) }
 0x1d2   : > { %v1217_v16 = vadd.f32 %v1873_v15, %v2472_v14  ;;  %v1208_v1 = vpop.f32.mrb[17].mxu1  ;;  %1462 = vst [vmem:[%s2684_s21 + $0x20] sm:$0xff] (%p2096_p5), %v1461_v60  ;;  %1464 = vst [vmem:[%s2684_s21 + $0x28] sm:$0xff] (%p2096_p5), %v1463_v23  ;;  %v1483_v13 = vld [vmem:[%s2476_s7 + $0x78] sm:$0xff] (%p2096_p5)  ;;  %v1485_v15 = vld [vmem:[%s2476_s7 + $0x80] sm:$0xff] (%p2096_p5) }
 0x1d3   : > { %v1209_v0 = vadd.f32 %v2472_v14, %v1208_v1  ;;  %v1863_v18 = vpop.f32.mrb[24].mxu0  ;;  %v1874_v61 = vpop.f32.mrb[18].mxu1  ;;  %1466 = vst [vmem:[%s2684_s21 + $0x30] sm:$0xff] (%p2096_p5), %v1465_v42  ;;  %1468 = vst [vmem:[%s2684_s21 + $0x38] sm:$0xff] (%p2096_p5), %v1467_v63  ;;  %v1489_v1 = vld [vmem:[%s2476_s7 + $0x90] sm:$0xff] (%p2096_p5) }
 0x1d4   : > { %1758 = vst.msk [vmem:[%s2476_s7 + $0x190] sm:$0xff] %vm445_vm1, %v1217_v16  ;;  %v1099_v20 = vadd.f32 %v1863_v18, %v2472_v14  ;;  %v1220_v5 = vadd.f32 %v1874_v61, %v2472_v14  ;;  %v1090_v21 = vpop.f32.mrb[25].mxu0  ;;  %v1211_v26 = vpop.f32.mrb[19].mxu1  ;;  %1470 = vst [vmem:[%s2684_s21 + $0x40] sm:$0xff] (%p2096_p5), %v1469_v6  ;;  %v1487_v16 = vld [vmem:[%s2476_s7 + $0x88] sm:$0xff] (%p2096_p5)  ;;  %v1493_v18 = vld [vmem:[%s2476_s7 + $0xa0] sm:$0xff] (%p2096_p5) }
 0x1d5   : > { %1756 = vst.msk [vmem:[%s2476_s7 + $0x180] sm:$0xff] %vm445_vm1, %v1209_v0  ;;  %v1091_v29 = vadd.f32 %v2472_v14, %v1090_v21  ;;  %v1212_v30 = vadd.f32 %v2472_v14, %v1211_v26  ;;  %v1864_v10 = vpop.f32.mrb[26].mxu0  ;;  %1472 = vst [vmem:[%s2684_s21 + $0x48] sm:$0xff] (%p2096_p5), %v1471_v7  ;;  %v1491_v0 = vld [vmem:[%s2476_s7 + $0x98] sm:$0xff] (%p2096_p5)  ;;  %v1495_v61 = vld [vmem:[%s2476_s7 + $0xa8] sm:$0xff] (%p2096_p5) }
 0x1d6   : > { %1739 = vst.msk [vmem:[%s2476_s7 + $0x150] sm:$0xff] %vm445_vm1, %v1099_v20  ;;  %1759 = vst.msk [vmem:[%s2476_s7 + $0x198] sm:$0xff] %vm445_vm1, %v1220_v5  ;;  %v1102_v4 = vadd.f32 %v1864_v10, %v2472_v14  ;;  %v1093_v31 = vpop.f32.mrb[27].mxu0  ;;  %v1497_v20 = vld [vmem:[%s2476_s7 + $0xb0] sm:$0xff] (%p2096_p5)  ;;  %v1499_v5 = vld [vmem:[%s2476_s7 + $0xb8] sm:$0xff] (%p2096_p5) }
 0x1d7   : > { %1737 = vst.msk [vmem:[%s2476_s7 + $0x140] sm:$0xff] %vm445_vm1, %v1091_v29  ;;  %1757 = vst.msk [vmem:[%s2476_s7 + $0x188] sm:$0xff] %vm445_vm1, %v1212_v30  ;;  %v1094_v32 = vadd.f32 %v2472_v14, %v1093_v31  ;;  %v1501_v21 = vld [vmem:[%s2476_s7 + $0xc0] sm:$0xff] (%p2096_p5)  ;;  %v1503_v26 = vld [vmem:[%s2476_s7 + $0xc8] sm:$0xff] (%p2096_p5) }
 0x1d8   : > { %1740 = vst.msk [vmem:[%s2476_s7 + $0x158] sm:$0xff] %vm445_vm1, %v1102_v4  ;;  %1474 = vst [vmem:[%s2684_s21 + $0x50] sm:$0xff] (%p2096_p5), %v1473_v8  ;;  %v1505_v29 = vld [vmem:[%s2476_s7 + $0xd0] sm:$0xff] (%p2096_p5)  ;;  %v1507_v30 = vld [vmem:[%s2476_s7 + $0xd8] sm:$0xff] (%p2096_p5) }
 0x1d9   : > { %1738 = vst.msk [vmem:[%s2476_s7 + $0x148] sm:$0xff] %vm445_vm1, %v1094_v32  ;;  %v1877_v34 = vpop.f32.mrb[20].mxu1  ;;  %1476 = vst [vmem:[%s2684_s21 + $0x58] sm:$0xff] (%p2096_p5), %v1475_v9  ;;  %v1509_v10 = vld [vmem:[%s2476_s7 + $0xe0] sm:$0xff] (%p2096_p5)  ;;  %v1511_v4 = vld [vmem:[%s2476_s7 + $0xe8] sm:$0xff] (%p2096_p5) }
 0x1da   : > { %v1233_v35 = vadd.f32 %v1877_v34, %v2472_v14  ;;  %v1224_v36 = vpop.f32.mrb[21].mxu1  ;;  %1478 = vst [vmem:[%s2684_s21 + $0x60] sm:$0xff] (%p2096_p5), %v1477_v11  ;;  %1480 = vst [vmem:[%s2684_s21 + $0x68] sm:$0xff] (%p2096_p5), %v1479_v3  ;;  %v1513_v31 = vld [vmem:[%s2476_s7 + $0xf0] sm:$0xff] (%p2096_p5)  ;;  %v1515_v32 = vld [vmem:[%s2476_s7 + $0xf8] sm:$0xff] (%p2096_p5) }
 0x1db   : > { %v1225_v37 = vadd.f32 %v2472_v14, %v1224_v36  ;;  %v1867_v17 = vpop.f32.mrb[28].mxu0  ;;  %v1878_v44 = vpop.f32.mrb[22].mxu1  ;;  %1482 = vst [vmem:[%s2684_s21 + $0x70] sm:$0xff] (%p2096_p5), %v1481_v12  ;;  %1484 = vst [vmem:[%s2684_s21 + $0x78] sm:$0xff] (%p2096_p5), %v1483_v13  ;;  %v1517_v34 = vld [vmem:[%s2476_s7 + $0x100] sm:$0xff] (%p2096_p5)  ;;  %v1521_v36 = vld [vmem:[%s2476_s7 + $0x110] sm:$0xff] (%p2096_p5) }
 0x1dc   : > { %1762 = vst.msk [vmem:[%s2476_s7 + $0x1b0] sm:$0xff] %vm445_vm1, %v1233_v35  ;;  %v1115_v38 = vadd.f32 %v1867_v17, %v2472_v14  ;;  %v1236_v62 = vadd.f32 %v1878_v44, %v2472_v14  ;;  %v1106_v39 = vpop.f32.mrb[29].mxu0  ;;  %v1227_v24 = vpop.f32.mrb[23].mxu1  ;;  %1486 = vst [vmem:[%s2684_s21 + $0x100] sm:$0xff] (%p2096_p5), %v1485_v15  ;;  %v1519_v35 = vld [vmem:[%s2476_s7 + $0x108] sm:$0xff] (%p2096_p5)  ;;  %v1525_v17 = vld [vmem:[%s2476_s7 + $0x120] sm:$0xff] (%p2096_p5) }
 0x1dd   : > { %1760 = vst.msk [vmem:[%s2476_s7 + $0x1a0] sm:$0xff] %vm445_vm1, %v1225_v37  ;;  %v1107_v43 = vadd.f32 %v2472_v14, %v1106_v39  ;;  %v1228_v51 = vadd.f32 %v2472_v14, %v1227_v24  ;;  %v1868_v2 = vpop.f32.mrb[30].mxu0  ;;  %1488 = vst [vmem:[%s2684_s21 + $0x108] sm:$0xff] (%p2096_p5), %v1487_v16  ;;  %v1523_v37 = vld [vmem:[%s2476_s7 + $0x118] sm:$0xff] (%p2096_p5)  ;;  %v1527_v44 = vld [vmem:[%s2476_s7 + $0x128] sm:$0xff] (%p2096_p5) }
 0x1de   : > { %1743 = vst.msk [vmem:[%s2476_s7 + $0x170] sm:$0xff] %vm445_vm1, %v1115_v38  ;;  %1763 = vst.msk [vmem:[%s2476_s7 + $0x1b8] sm:$0xff] %vm445_vm1, %v1236_v62  ;;  %v1118_v45 = vadd.f32 %v1868_v2, %v2472_v14  ;;  %v1109_v46 = vpop.f32.mrb[31].mxu0  ;;  %v1529_v38 = vld [vmem:[%s2476_s7 + $0x130] sm:$0xff] (%p2096_p5)  ;;  %v1531_v62 = vld [vmem:[%s2476_s7 + $0x138] sm:$0xff] (%p2096_p5) }
 0x1df   : > { %1741 = vst.msk [vmem:[%s2476_s7 + $0x160] sm:$0xff] %vm445_vm1, %v1107_v43  ;;  %1761 = vst.msk [vmem:[%s2476_s7 + $0x1a8] sm:$0xff] %vm445_vm1, %v1228_v51  ;;  %v1110_v41 = vadd.f32 %v2472_v14, %v1109_v46  ;;  %v1533_v39 = vld [vmem:[%s2476_s7 + $0x140] sm:$0xff] (%p2096_p5)  ;;  %v1537_v43 = vld [vmem:[%s2476_s7 + $0x150] sm:$0xff] (%p2096_p5) }
 0x1e0   : > { %1744 = vst.msk [vmem:[%s2476_s7 + $0x178] sm:$0xff] %vm445_vm1, %v1118_v45  ;;  %1490 = vst [vmem:[%s2684_s21 + $0x110] sm:$0xff] (%p2096_p5), %v1489_v1  ;;  %v1535_v24 = vld [vmem:[%s2476_s7 + $0x148] sm:$0xff] (%p2096_p5)  ;;  %v1539_v51 = vld [vmem:[%s2476_s7 + $0x158] sm:$0xff] (%p2096_p5) }
 0x1e1   : > { %1742 = vst.msk [vmem:[%s2476_s7 + $0x168] sm:$0xff] %vm445_vm1, %v1110_v41  ;;  %v1881_v33 = vpop.f32.mrb[24].mxu1  ;;  %1492 = vst [vmem:[%s2684_s21 + $0x118] sm:$0xff] (%p2096_p5), %v1491_v0 }
 0x1e2   : > { %v1249_v40 = vadd.f32 %v1881_v33, %v2472_v14  ;;  %v1240_v49 = vpop.f32.mrb[25].mxu1  ;;  %1494 = vst [vmem:[%s2684_s21 + $0x120] sm:$0xff] (%p2096_p5), %v1493_v18  ;;  %1496 = vst [vmem:[%s2684_s21 + $0x128] sm:$0xff] (%p2096_p5), %v1495_v61  ;;  %v1549_v33 = vld [vmem:[%s2476_s7 + $0x180] sm:$0xff] (%p2096_p5) }
 0x1e3   : > { %v1241_v19 = vadd.f32 %v2472_v14, %v1240_v49  ;;  %v1882_v27 = vpop.f32.mrb[26].mxu1  ;;  %1498 = vst [vmem:[%s2684_s21 + $0x130] sm:$0xff] (%p2096_p5), %v1497_v20  ;;  %1500 = vst [vmem:[%s2684_s21 + $0x138] sm:$0xff] (%p2096_p5), %v1499_v5  ;;  %v1553_v49 = vld [vmem:[%s2476_s7 + $0x190] sm:$0xff] (%p2096_p5) }
 0x1e4   : > { %1766 = vst.msk [vmem:[%s2476_s7 + $0x1d0] sm:$0xff] %vm445_vm1, %v1249_v40  ;;  %v1252_v22 = vadd.f32 %v1882_v27, %v2472_v14  ;;  %v1243_v47 = vpop.f32.mrb[27].mxu1  ;;  %1502 = vst [vmem:[%s2684_s21 + $0x140] sm:$0xff] (%p2096_p5), %v1501_v21  ;;  %v1551_v40 = vld [vmem:[%s2476_s7 + $0x188] sm:$0xff] (%p2096_p5)  ;;  %v1557_v27 = vld [vmem:[%s2476_s7 + $0x1a0] sm:$0xff] (%p2096_p5) }
 0x1e5   : > { %1764 = vst.msk [vmem:[%s2476_s7 + $0x1c0] sm:$0xff] %vm445_vm1, %v1241_v19  ;;  %v1244_v48 = vadd.f32 %v2472_v14, %v1243_v47  ;;  %1504 = vst [vmem:[%s2684_s21 + $0x148] sm:$0xff] (%p2096_p5), %v1503_v26  ;;  %v1545_v46 = vld [vmem:[%s2476_s7 + $0x170] sm:$0xff] (%p2096_p5)  ;;  %v1555_v19 = vld [vmem:[%s2476_s7 + $0x198] sm:$0xff] (%p2096_p5) }
 0x1e6   : > { %1767 = vst.msk [vmem:[%s2476_s7 + $0x1d8] sm:$0xff] %vm445_vm1, %v1252_v22  ;;  %1506 = vst [vmem:[%s2684_s21 + $0x150] sm:$0xff] (%p2096_p5), %v1505_v29  ;;  %v1541_v2 = vld [vmem:[%s2476_s7 + $0x160] sm:$0xff] (%p2096_p5)  ;;  %v1559_v22 = vld [vmem:[%s2476_s7 + $0x1a8] sm:$0xff] (%p2096_p5) }
 0x1e7   : > { %1765 = vst.msk [vmem:[%s2476_s7 + $0x1c8] sm:$0xff] %vm445_vm1, %v1244_v48  ;;  %1508 = vst [vmem:[%s2684_s21 + $0x158] sm:$0xff] (%p2096_p5), %v1507_v30  ;;  %v1547_v41 = vld [vmem:[%s2476_s7 + $0x178] sm:$0xff] (%p2096_p5)  ;;  %v1561_v47 = vld [vmem:[%s2476_s7 + $0x1b0] sm:$0xff] (%p2096_p5) }
 0x1e8   : > { %1510 = vst [vmem:[%s2684_s21 + $0x160] sm:$0xff] (%p2096_p5), %v1509_v10  ;;  %1512 = vst [vmem:[%s2684_s21 + $0x168] sm:$0xff] (%p2096_p5), %v1511_v4  ;;  %v1543_v45 = vld [vmem:[%s2476_s7 + $0x168] sm:$0xff] (%p2096_p5)  ;;  %v1563_v48 = vld [vmem:[%s2476_s7 + $0x1b8] sm:$0xff] (%p2096_p5) }
 0x1e9   : > { %v1885_v50 = vpop.f32.mrb[28].mxu1  ;;  %1294 = sbr.rel (!%p2096_p5) target bundleno = 509 (0x1fd), region = 36  ;;  %1514 = vst [vmem:[%s2684_s21 + $0x170] sm:$0xff] (%p2096_p5), %v1513_v31  ;;  %1516 = vst [vmem:[%s2684_s21 + $0x178] sm:$0xff] (%p2096_p5), %v1515_v32 }
 0x1ea   : > { %v1265_v52 = vadd.f32 %v1885_v50, %v2472_v14  ;;  %v1256_v28 = vpop.f32.mrb[29].mxu1  ;;  %1518 = vst [vmem:[%s2684_s21 + $0x200] sm:$0xff] (%p2096_p5), %v1517_v34  ;;  %1520 = vst [vmem:[%s2684_s21 + $0x208] sm:$0xff] (%p2096_p5), %v1519_v35 }
 0x1eb   : > { %v1257_v53 = vadd.f32 %v2472_v14, %v1256_v28  ;;  %v1886_v25 = vpop.f32.mrb[30].mxu1  ;;  %1522 = vst [vmem:[%s2684_s21 + $0x210] sm:$0xff] (%p2096_p5), %v1521_v36  ;;  %1524 = vst [vmem:[%s2684_s21 + $0x218] sm:$0xff] (%p2096_p5), %v1523_v37  ;;  %v1569_v28 = vld [vmem:[%s2476_s7 + $0x1d0] sm:$0xff] (%p2096_p5) }
 0x1ec   : > { %1770 = vst.msk [vmem:[%s2476_s7 + $0x1f0] sm:$0xff] %vm445_vm1, %v1265_v52  ;;  %v1268_v54 = vadd.f32 %v1886_v25, %v2472_v14  ;;  %v1259_v55 = vpop.f32.mrb[31].mxu1  ;;  %1526 = vst [vmem:[%s2684_s21 + $0x220] sm:$0xff] (%p2096_p5), %v1525_v17  ;;  %v1565_v50 = vld [vmem:[%s2476_s7 + $0x1c0] sm:$0xff] (%p2096_p5) }
 0x1ed   : > { %1768 = vst.msk [vmem:[%s2476_s7 + $0x1e0] sm:$0xff] %vm445_vm1, %v1257_v53  ;;  %v1260_v56 = vadd.f32 %v2472_v14, %v1259_v55  ;;  %v1453_v14 = vld [vmem:[%s2476_s7] sm:$0xff] (%p2096_p5)  ;;  %1528 = vst [vmem:[%s2684_s21 + $0x228] sm:$0xff] (%p2096_p5), %v1527_v44  ;;  %v1571_v53 = vld [vmem:[%s2476_s7 + $0x1d8] sm:$0xff] (%p2096_p5) }
 0x1ee   : > { %1771 = vst.msk [vmem:[%s2476_s7 + $0x1f8] sm:$0xff] %vm445_vm1, %v1268_v54  ;;  %1454 = vst [vmem:[%s2684_s21] sm:$0xff] (%p2096_p5), %v1453_v14  ;;  %v1567_v52 = vld [vmem:[%s2476_s7 + $0x1c8] sm:$0xff] (%p2096_p5) }
 0x1ef   : > { %1769 = vst.msk [vmem:[%s2476_s7 + $0x1e8] sm:$0xff] %vm445_vm1, %v1260_v56  ;;  %1530 = vst [vmem:[%s2684_s21 + $0x230] sm:$0xff] (%p2096_p5), %v1529_v38 }
 0x1f0   : > { %1532 = vst [vmem:[%s2684_s21 + $0x238] sm:$0xff] %v1531_v62  ;;  %1534 = vst [vmem:[%s2684_s21 + $0x240] sm:$0xff] %v1533_v39 }
 0x1f1   : > { %1536 = vst [vmem:[%s2684_s21 + $0x248] sm:$0xff] %v1535_v24  ;;  %1538 = vst [vmem:[%s2684_s21 + $0x250] sm:$0xff] %v1537_v43 }
 0x1f2   : > { %1540 = vst [vmem:[%s2684_s21 + $0x258] sm:$0xff] %v1539_v51  ;;  %1542 = vst [vmem:[%s2684_s21 + $0x260] sm:$0xff] %v1541_v2 }
 0x1f3   : > { %1544 = vst [vmem:[%s2684_s21 + $0x268] sm:$0xff] %v1543_v45  ;;  %1546 = vst [vmem:[%s2684_s21 + $0x270] sm:$0xff] %v1545_v46  ;;  %v1577_v55 = vld [vmem:[%s2476_s7 + $0x1f0] sm:$0xff] }
 0x1f4   : > { %1548 = vst [vmem:[%s2684_s21 + $0x278] sm:$0xff] %v1547_v41  ;;  %1550 = vst [vmem:[%s2684_s21 + $0x300] sm:$0xff] %v1549_v33  ;;  %v1573_v25 = vld [vmem:[%s2476_s7 + $0x1e0] sm:$0xff] }
 0x1f5   : > { %1552 = vst [vmem:[%s2684_s21 + $0x308] sm:$0xff] %v1551_v40  ;;  %1554 = vst [vmem:[%s2684_s21 + $0x310] sm:$0xff] %v1553_v49  ;;  %v1579_v56 = vld [vmem:[%s2476_s7 + $0x1f8] sm:$0xff] }
 0x1f6   : > { %1556 = vst [vmem:[%s2684_s21 + $0x318] sm:$0xff] %v1555_v19  ;;  %1558 = vst [vmem:[%s2684_s21 + $0x320] sm:$0xff] %v1557_v27  ;;  %v1575_v54 = vld [vmem:[%s2476_s7 + $0x1e8] sm:$0xff] }
 0x1f7   : > { %1560 = vst [vmem:[%s2684_s21 + $0x328] sm:$0xff] %v1559_v22  ;;  %1562 = vst [vmem:[%s2684_s21 + $0x330] sm:$0xff] %v1561_v47 }
 0x1f8   : > { %1564 = vst [vmem:[%s2684_s21 + $0x338] sm:$0xff] %v1563_v48  ;;  %1566 = vst [vmem:[%s2684_s21 + $0x340] sm:$0xff] %v1565_v50 }
 0x1f9   : > { %1568 = vst [vmem:[%s2684_s21 + $0x348] sm:$0xff] %v1567_v52  ;;  %1570 = vst [vmem:[%s2684_s21 + $0x350] sm:$0xff] %v1569_v28 }
 0x1fa   : > { %1572 = vst [vmem:[%s2684_s21 + $0x358] sm:$0xff] %v1571_v53  ;;  %1574 = vst [vmem:[%s2684_s21 + $0x360] sm:$0xff] %v1573_v25 }
 0x1fb   : > { %1576 = vst [vmem:[%s2684_s21 + $0x368] sm:$0xff] %v1575_v54  ;;  %1578 = vst [vmem:[%s2684_s21 + $0x370] sm:$0xff] %v1577_v55 }
 0x1fc   : > { %1580 = vst [vmem:[%s2684_s21 + $0x378] sm:$0xff] %v1579_v56 }
 0x1fd PF: > { %s13_s18 = sadd.s32 1, %s2025_s18   ;;  %s2831_s12 = smov %s2005_s13 }
 0x1fe   : > { %p10_p10 = scmp.ge.s32.totalorder %s13_s18, 6   ;;  %s2832_s13 = smov %s2107_s27 }
 0x1ff   : > { %s2833_s14 = smov %s2017_s16  ;;  %s2834_s15 = smov %s2021_s17 }
 0x200   : > { %s2835_s16 = smov %s2838_s19  ;;  %s2836_s17 = smov %s2842_s20 }
 0x201   :  { %12 = sbr.rel (!%p10_p10) target bundleno = 4 (0x4), region = 107 }

</bundles_post_ra>
